<compile_context>
chip_gen: v7x
topology: tpu7x:2x2x1
jax: 0.10.0
libtpu: 0.0.40
codegen_flags: <defaults>
</compile_context>

<pallas_src>
import jax
import jax.numpy as jnp
from jax import lax
from jax.experimental import pallas as pl
from jax.experimental.pallas import tpu as pltpu


def _silu(x):
    return x * jax.nn.sigmoid(x)


def egnn_kernel(
    idx_ref,                     # (G, tE, 2) int32  [row | col], padded edges = -1
    x_ref,                       # (G, N, I+3) f32   [h | coord]
    wslab_ref,                   # (3I+3H, H) cdt    [w1a; w1b; w2; wc1; w3a; w3b]
    vrows_ref,                   # (6, H) f32        [w1r; b1; b2; bc1; wc2_row; b3]
    w4_ref, b4_ref,              # (H, O) cdt, (1, O) f32
    h_out_ref, coord_out_ref,    # (G, N, O), (G, N, 3) f32
    hw1a_scr, hw1b_scr,          # (G, N, H) f32 — node-level h@W1a / h@W1b
    agg4_scr, aggh_scr,          # (G, N, 4) f32 [sum(trans)|counts], (G, N, H) f32
):
    f32 = jnp.float32
    cdt = wslab_ref.dtype
    G, tE, _ = idx_ref.shape
    N = x_ref.shape[1]
    I = x_ref.shape[2] - 3
    H = wslab_ref.shape[1]
    O = h_out_ref.shape[2]

    k = pl.program_id(1)
    nk = pl.num_programs(1)

    x = x_ref[...]                          # (G, N, I+3) f32
    h = x[..., :I]                          # (G, N, I)
    coord = x[..., I:]                      # (G, N, 3)

    # static row offsets into the packed weight slab
    o_w1a, o_w1b = 0, I
    o_w2, o_wc1 = 2 * I, 2 * I + H
    o_w3a, o_w3b = 2 * I + 2 * H, 3 * I + 2 * H

    @pl.when(k == 0)
    def _init():
        # Push edge_mlp layer 1 through the gather: node-level matmuls, reused
        # across every edge tile of this graph group.
        h2 = h.reshape(G * N, I).astype(cdt)
        hw1a_scr[...] = jnp.dot(h2, wslab_ref[o_w1a:o_w1a + I, :],
                                preferred_element_type=f32).reshape(G, N, H)
        hw1b_scr[...] = jnp.dot(h2, wslab_ref[o_w1b:o_w1b + I, :],
                                preferred_element_type=f32).reshape(G, N, H)
        agg4_scr[...] = jnp.zeros_like(agg4_scr)
        aggh_scr[...] = jnp.zeros_like(aggh_scr)

    # f32 row slab
    w1r = vrows_ref[0:1, :]
    b1 = vrows_ref[1:2, :]
    b2 = vrows_ref[2:3, :]
    bc1 = vrows_ref[3:4, :]
    wc2 = vrows_ref[4:5, :]
    b3 = vrows_ref[5:6, :]

    # ---- one-hot selectors for this edge tile (padded edges -> all-zero rows) ----
    idx = idx_ref[...]                                            # (G, tE, 2)
    row = idx[..., 0:1]
    col = idx[..., 1:2]
    node_iota = lax.broadcasted_iota(jnp.int32, (G, tE, N), 2)
    sel_r = (row == node_iota).astype(f32)                        # (G, tE, N)
    sel_c = (col == node_iota).astype(f32)

    # ---- gather: W1 already applied at node level; coords stay f32 (exact cdiff) ----
    m1_h = (jnp.einsum('gen,gnh->geh', sel_r, hw1a_scr[...],
                       preferred_element_type=f32)
            + jnp.einsum('gen,gnh->geh', sel_c, hw1b_scr[...],
                         preferred_element_type=f32))             # (G, tE, H)
    cdiff = jnp.einsum('gen,gnc->gec', sel_r - sel_c, coord,
                       preferred_element_type=f32)                # (G, tE, 3)
    radial = jnp.sum(cdiff * cdiff, axis=-1, keepdims=True)       # (G, tE, 1)

    # ---- edge_model ----
    m1 = _silu(m1_h + radial * w1r + b1)                          # (G, tE, H)
    m1f = m1.reshape(G * tE, H).astype(cdt)
    edge_feat = _silu(jnp.dot(m1f, wslab_ref[o_w2:o_w2 + H, :],
                              preferred_element_type=f32) + b2)   # (G*tE, H) f32

    # ---- coord_model: head as VPU multiply + lane reduce (no 1-lane MXU matmul) ----
    c1 = _silu(jnp.dot(edge_feat.astype(cdt), wslab_ref[o_wc1:o_wc1 + H, :],
                       preferred_element_type=f32) + bc1)
    s = jnp.sum(c1 * wc2, axis=-1, keepdims=True)                 # (G*tE, 1)
    trans = cdiff.reshape(G * tE, 3) * s                          # (G*tE, 3)

    # ---- scatter-accumulate into VMEM scratch (f32, exact sums) ----
    ones = jnp.ones((G, tE, 1), f32)
    t4 = jnp.concatenate([trans.reshape(G, tE, 3), ones], axis=-1)    # (G, tE, 4)
    agg4_scr[...] += jnp.einsum('gen,gec->gnc', sel_r, t4,
                                preferred_element_type=f32)
    aggh_scr[...] += jnp.einsum('gen,geh->gnh', sel_r,
                                edge_feat.reshape(G, tE, H),
                                preferred_element_type=f32)

    @pl.when(k == nk - 1)
    def _finalize():
        agg4 = agg4_scr[...]
        agg_sum = agg4[..., :3]
        counts = agg4[..., 3:4]
        # unsorted_segment_mean with clamp(min=1); exact divide (coords_agg='mean')
        coord_out_ref[...] = coord + agg_sum / jnp.maximum(counts, 1.0)

        # ---- node_model: split-K (h @ W3a + agg_h @ W3b), no lane concat ----
        h2 = h.reshape(G * N, I).astype(cdt)
        agg_h = aggh_scr[...].reshape(G * N, H).astype(cdt)
        n1 = _silu(jnp.dot(h2, wslab_ref[o_w3a:o_w3a + I, :],
                           preferred_element_type=f32)
                   + jnp.dot(agg_h, wslab_ref[o_w3b:o_w3b + H, :],
                             preferred_element_type=f32)
                   + b3)
        out = jnp.dot(n1.astype(cdt), w4_ref[...],
                      preferred_element_type=f32) + b4_ref[...]
        h_out_ref[...] = h + out.reshape(G, N, O)                 # residual (I == O)


def egnn_layer_pallas(h, coord, row, col, params, *,
                      compute_dtype=jnp.float32,
                      graphs_per_step=None, edge_tile=None):
    """Batched EGNN layer forward.

    h: (B, N, I) f32, coord: (B, N, 3) f32, row/col: (B, E) int (receiver/sender).
    compute_dtype: operand dtype for the dense MLP matmuls only (bf16 recommended
    on all chips); one-hot gathers/scatters, coordinates and all segment sums are
    kept f32, and accumulation / elementwise math is always f32.
    graphs_per_step: graphs processed per grid step (fills MXU M, amortizes grid
    overhead). edge_tile: edges per inner grid step (caps one-hot VMEM footprint).
    """
    f32 = jnp.float32
    B, N, I = h.shape
    E = row.shape[-1]
    H = params["w2"].shape[0]
    O = params["w4"].shape[1]
    assert I == O, "residual connection requires input_nf == output_nf"
    cdt = compute_dtype

    # graphs per step: enough to reach ~128 edge rows, while dividing B
    if graphs_per_step is None:
        target = max(1, (128 + E - 1) // E)
        graphs_per_step = 1
        for d in range(1, B + 1):
            if B % d == 0 and d <= target:
                graphs_per_step = d
    G = graphs_per_step
    assert B % G == 0, "graphs_per_step must divide batch size"

    # edge tiling: default is a single (sublane-aligned) tile over all edges
    if edge_tile is None:
        edge_tile = ((E + 7) // 8) * 8
    tE = edge_tile
    assert tE % 8 == 0, "edge_tile must be a multiple of 8"
    E_pad = ((E + tE - 1) // tE) * tE

    # ---- pack inputs ----
    x = jnp.concatenate([h.astype(f32), coord.astype(f32)], axis=-1)     # (B, N, I+3)
    idx = jnp.stack([row, col], axis=-1).astype(jnp.int32)               # (B, E, 2)
    if E_pad != E:
        idx = jnp.pad(idx, ((0, 0), (0, E_pad - E), (0, 0)), constant_values=-1)

    # ---- pack weights: one compute-dtype slab + one f32 row slab + w4/b4 ----
    w1 = params["w1"]                      # (2I+1, H): [W1a; W1b; w1r]
    w3 = params["w3"]                      # (I+H, H):  [W3a; W3b]
    w_slab = jnp.concatenate(
        [w1[:I], w1[I:2 * I], params["w2"], params["wc1"], w3[:I], w3[I:]],
        axis=0).astype(cdt)                                              # (3I+3H, H)
    vrows = jnp.concatenate(
        [w1[2 * I:2 * I + 1], params["b1"], params["b2"], params["bc1"],
         params["wc2"].T, params["b3"]], axis=0).astype(f32)             # (6, H)
    w4 = params["w4"].astype(cdt)
    b4 = params["b4"].astype(f32)

    grid = (B // G, E_pad // tE)

    def resident(arr):
        zero = (0,) * arr.ndim
        return pl.BlockSpec(arr.shape, lambda b, k, _z=zero: _z)

    grid_spec = pltpu.PrefetchScalarGridSpec(
        num_scalar_prefetch=0,
        grid=grid,
        in_specs=[
            pl.BlockSpec((G, tE, 2), lambda b, k: (b, k, 0)),            # idx
            pl.BlockSpec((G, N, I + 3), lambda b, k: (b, 0, 0)),         # [h|coord]
            resident(w_slab), resident(vrows), resident(w4), resident(b4),
        ],
        out_specs=[
            pl.BlockSpec((G, N, O), lambda b, k: (b, 0, 0)),             # h_out
            pl.BlockSpec((G, N, 3), lambda b, k: (b, 0, 0)),             # coord_out
        ],
        scratch_shapes=[
            pltpu.VMEM((G, N, H), f32),    # h @ W1a
            pltpu.VMEM((G, N, H), f32),    # h @ W1b
            pltpu.VMEM((G, N, 4), f32),    # [sum(trans) | counts]
            pltpu.VMEM((G, N, H), f32),    # sum(edge_feat)
        ],
    )

    out_shape = (
        jax.ShapeDtypeStruct((B, N, O), f32),
        jax.ShapeDtypeStruct((B, N, 3), f32),
    )

    return pl.pallas_call(
        egnn_kernel,
        out_shape=out_shape,
        grid_spec=grid_spec,
        compiler_params=pltpu.CompilerParams(
            # graph-group axis is independent (v7x: shards across the 2 TCs);
            # the edge-tile axis carries the scatter accumulators.
            dimension_semantics=("parallel", "arbitrary"),
            vmem_limit_bytes=32 * 1024 * 1024,   # raise v5e's 16 MiB scoped default
        ),
    )(idx, x, w_slab, vrows, w4, b4)


def egnn_layer_ref(h, coord, row, col, params):
    """Pure-JAX single-graph reference mirroring the PyTorch forward exactly."""
    h_row, h_col = h[row], h[col]
    cdiff = coord[row] - coord[col]
    radial = jnp.sum(cdiff ** 2, axis=1, keepdims=True)

    edge_in = jnp.concatenate([h_row, h_col, radial], axis=1)
    m1 = jax.nn.silu(edge_in @ params["w1"] + params["b1"])
    edge_feat = jax.nn.silu(m1 @ params["w2"] + params["b2"])

    c1 = jax.nn.silu(edge_feat @ params["wc1"] + params["bc1"])
    s = c1 @ params["wc2"]
    trans = cdiff * s
    N = h.shape[0]
    agg_sum = jnp.zeros((N, 3), jnp.float32).at[row].add(trans)
    counts = jnp.zeros((N, 3), jnp.float32).at[row].add(jnp.ones_like(trans))
    coord_out = coord + agg_sum / jnp.maximum(counts, 1.0)

    agg_h = jnp.zeros((N, edge_feat.shape[1]), jnp.float32).at[row].add(edge_feat)
    n1 = jax.nn.silu(jnp.concatenate([h, agg_h], axis=1) @ params["w3"] + params["b3"])
    out = n1 @ params["w4"] + params["b4"]
    return h + out, coord_out


def init_params(key, input_nf, output_nf, hidden_nf):
    I, O, H = input_nf, output_nf, hidden_nf
    ks = jax.random.split(key, 11)

    def lin_w(k, fan_in, shape):
        bound = 1.0 / jnp.sqrt(fan_in)
        return jax.random.uniform(k, shape, jnp.float32, -bound, bound)

    edge_in = 2 * I + 1
    node_in = H + I
    return {
        # edge_mlp: Linear(2I+1, H) -> SiLU -> Linear(H, H) -> SiLU
        "w1": lin_w(ks[0], edge_in, (edge_in, H)),
        "b1": lin_w(ks[1], edge_in, (1, H)),
        "w2": lin_w(ks[2], H, (H, H)),
        "b2": lin_w(ks[3], H, (1, H)),
        # coord_mlp: Linear(H, H) -> SiLU -> Linear(H, 1, bias=False), xavier gain=1e-3
        "wc1": lin_w(ks[4], H, (H, H)),
        "bc1": lin_w(ks[5], H, (1, H)),
        "wc2": 0.001 * lin_w(ks[6], H, (H, 1)),
        # node_mlp: Linear(H+I, H) -> SiLU -> Linear(H, O)
        "w3": lin_w(ks[7], node_in, (node_in, H)),
        "b3": lin_w(ks[8], node_in, (1, H)),
        "w4": lin_w(ks[9], H, (H, O)),
        "b4": lin_w(ks[10], H, (1, O)),
    }


if __name__ == "__main__":
    B = 4            # batch of graphs
    N = 8            # nodes per graph
    I = O = H = 32   # input_nf = output_nf = hidden_nf (residual requires I == O)

    key = jax.random.PRNGKey(0)
    kh, kc, kp = jax.random.split(key, 3)

    h = jax.random.normal(kh, (B, N, I), jnp.float32)
    coord = jax.random.normal(kc, (B, N, 3), jnp.float32)

    # fully connected graph without self-loops: E = N*(N-1) = 56
    src, dst = jnp.meshgrid(jnp.arange(N), jnp.arange(N), indexing="ij")
    mask = src.ravel() != dst.ravel()
    row1 = src.ravel()[mask].astype(jnp.int32)
    col1 = dst.ravel()[mask].astype(jnp.int32)
    row = jnp.tile(row1[None, :], (B, 1))
    col = jnp.tile(col1[None, :], (B, 1))

    params = init_params(kp, I, O, H)

    # Pure-JAX reference (vmapped over the batch)
    ref_fn = jax.vmap(lambda hh, cc, rr, ll: egnn_layer_ref(hh, cc, rr, ll, params))
    h_ref, coord_ref = ref_fn(h, coord, row, col)

    # 1) f32 path; 2 graphs/step and edge_tile=32 exercises the multi-tile
    #    scatter accumulation (E=56 padded to 64 -> 2 edge tiles) on a 2x2 grid.
    h_out, coord_out = egnn_layer_pallas(h, coord, row, col, params,
                                         compute_dtype=jnp.float32,
                                         graphs_per_step=2, edge_tile=32)
    jax.block_until_ready((h_out, coord_out))
    assert jnp.allclose(h_out, h_ref, atol=1e-3, rtol=1e-3), "h mismatch (f32 path)"
    assert jnp.allclose(coord_out, coord_ref, atol=1e-3, rtol=1e-3), "coord mismatch (f32 path)"

    # 2) bf16 MXU operands for the dense MLP matmuls only; one-hots, coordinates,
    #    cdiff/trans and segment sums stay f32 (default graphs_per_step / edge_tile).
    h_bf, coord_bf = egnn_layer_pallas(h, coord, row, col, params,
                                       compute_dtype=jnp.bfloat16)
    jax.block_until_ready((h_bf, coord_bf))
    assert jnp.allclose(h_bf, h_ref, atol=5e-2, rtol=5e-2), "h mismatch (bf16 path)"
    assert jnp.allclose(coord_bf, coord_ref, atol=5e-2, rtol=5e-2), "coord mismatch (bf16 path)"

    print("KERNEL_OK")
</pallas_src>

<mosaic_0001>
module attributes {stable_mosaic.version = 11 : i64} {
  func.func @egnn_kernel(%arg0: i32, %arg1: i32, %arg2: memref<2x32x2xi32, #tpu.memory_space<vmem>>, %arg3: memref<2x8x35xf32, #tpu.memory_space<vmem>>, %arg4: memref<192x32xf32, #tpu.memory_space<vmem>>, %arg5: memref<6x32xf32, #tpu.memory_space<vmem>>, %arg6: memref<32x32xf32, #tpu.memory_space<vmem>>, %arg7: memref<1x32xf32, #tpu.memory_space<vmem>>, %arg8: memref<2x8x32xf32, #tpu.memory_space<vmem>>, %arg9: memref<2x8x3xf32, #tpu.memory_space<vmem>>, %arg10: memref<2x8x32xf32, #tpu.memory_space<vmem>>, %arg11: memref<2x8x32xf32, #tpu.memory_space<vmem>>, %arg12: memref<2x8x4xf32, #tpu.memory_space<vmem>>, %arg13: memref<2x8x32xf32, #tpu.memory_space<vmem>>) attributes {dimension_semantics = [#tpu.dimension_semantics<parallel>, #tpu.dimension_semantics<arbitrary>], iteration_bounds = array<i64: 2, 2>, scalar_prefetch = 0 : i64, scratch_operands = 4 : i64, tpu.core_type = #tpu.core_type<tc>, window_params = [{transform_indices = @transform_0, window_bounds = array<i64: 2, 32, 2>}, {transform_indices = @transform_1, window_bounds = array<i64: 2, 8, 35>}, {pipeline_mode = #tpu.pipeline_mode<synchronous>, transform_indices = @transform_2, window_bounds = array<i64: 192, 32>}, {pipeline_mode = #tpu.pipeline_mode<synchronous>, transform_indices = @transform_3, window_bounds = array<i64: 6, 32>}, {pipeline_mode = #tpu.pipeline_mode<synchronous>, transform_indices = @transform_4, window_bounds = array<i64: 32, 32>}, {pipeline_mode = #tpu.pipeline_mode<synchronous>, transform_indices = @transform_5, window_bounds = array<i64: 1, 32>}, {transform_indices = @transform_6, window_bounds = array<i64: 2, 8, 32>}, {transform_indices = @transform_7, window_bounds = array<i64: 2, 8, 3>}]} {
    %c0 = arith.constant 0 : index
    %c0_0 = arith.constant 0 : index
    %c0_1 = arith.constant 0 : index
    %0 = vector.load %arg3[%c0, %c0_0, %c0_1] : memref<2x8x35xf32, #tpu.memory_space<vmem>>, vector<2x8x35xf32>
    %1 = vector.extract_strided_slice %0 {offsets = [0, 0, 0], sizes = [2, 8, 32], strides = [1, 1, 1]} : vector<2x8x35xf32> to vector<2x8x32xf32>
    %2 = vector.extract_strided_slice %0 {offsets = [0, 0, 32], sizes = [2, 8, 3], strides = [1, 1, 1]} : vector<2x8x35xf32> to vector<2x8x3xf32>
    %c0_i32 = arith.constant 0 : i32
    %3 = arith.cmpi eq, %arg1, %c0_i32 : i32
    %4 = arith.extui %3 : i1 to i32
    %c0_i32_2 = arith.constant 0 : i32
    %5 = arith.cmpi ne, %4, %c0_i32_2 : i32
    scf.if %5 {
      %91 = vector.shape_cast %1 : vector<2x8x32xf32> to vector<16x32xf32>
      %c0_46 = arith.constant 0 : index
      %c0_47 = arith.constant 0 : index
      %92 = vector.load %arg4[%c0_46, %c0_47] : memref<192x32xf32, #tpu.memory_space<vmem>>, vector<32x32xf32>
      %cst_48 = arith.constant dense<0.000000e+00> : vector<16x32xf32>
      %93 = tpu.matmul %91, %92, %cst_48 {dimension_numbers = #tpu.dot_dimension_numbers<[1], [0], [0], [1], [0, 0, 1, 1], [], []>} : vector<16x32xf32>, vector<32x32xf32>, vector<16x32xf32> -> vector<16x32xf32>
      %94 = vector.shape_cast %93 : vector<16x32xf32> to vector<2x8x32xf32>
      %c0_49 = arith.constant 0 : index
      %c0_50 = arith.constant 0 : index
      %c0_51 = arith.constant 0 : index
      %95 = vector.load %arg10[%c0_49, %c0_50, %c0_51] : memref<2x8x32xf32, #tpu.memory_space<vmem>>, vector<2x8x32xf32>
      tpu.vector_store %arg10[%c0_49, %c0_50, %c0_51], %94 {strides = array<i32>} : memref<2x8x32xf32, #tpu.memory_space<vmem>>, vector<2x8x32xf32>,
      %c32 = arith.constant 32 : index
      %c0_52 = arith.constant 0 : index
      %96 = vector.load %arg4[%c32, %c0_52] : memref<192x32xf32, #tpu.memory_space<vmem>>, vector<32x32xf32>
      %cst_53 = arith.constant dense<0.000000e+00> : vector<16x32xf32>
      %97 = tpu.matmul %91, %96, %cst_53 {dimension_numbers = #tpu.dot_dimension_numbers<[1], [0], [0], [1], [0, 0, 1, 1], [], []>} : vector<16x32xf32>, vector<32x32xf32>, vector<16x32xf32> -> vector<16x32xf32>
      %98 = vector.shape_cast %97 : vector<16x32xf32> to vector<2x8x32xf32>
      %c0_54 = arith.constant 0 : index
      %c0_55 = arith.constant 0 : index
      %c0_56 = arith.constant 0 : index
      %99 = vector.load %arg11[%c0_54, %c0_55, %c0_56] : memref<2x8x32xf32, #tpu.memory_space<vmem>>, vector<2x8x32xf32>
      tpu.vector_store %arg11[%c0_54, %c0_55, %c0_56], %98 {strides = array<i32>} : memref<2x8x32xf32, #tpu.memory_space<vmem>>, vector<2x8x32xf32>,
      %cst_57 = arith.constant 0.000000e+00 : f32
      %100 = vector.broadcast %cst_57 : f32 to vector<2x8x4xf32>
      %c0_58 = arith.constant 0 : index
      %c0_59 = arith.constant 0 : index
      %c0_60 = arith.constant 0 : index
      %101 = vector.load %arg12[%c0_58, %c0_59, %c0_60] : memref<2x8x4xf32, #tpu.memory_space<vmem>>, vector<2x8x4xf32>
      tpu.vector_store %arg12[%c0_58, %c0_59, %c0_60], %100 {strides = array<i32>} : memref<2x8x4xf32, #tpu.memory_space<vmem>>, vector<2x8x4xf32>,
      %cst_61 = arith.constant 0.000000e+00 : f32
      %102 = vector.broadcast %cst_61 : f32 to vector<2x8x32xf32>
      %c0_62 = arith.constant 0 : index
      %c0_63 = arith.constant 0 : index
      %c0_64 = arith.constant 0 : index
      %103 = vector.load %arg13[%c0_62, %c0_63, %c0_64] : memref<2x8x32xf32, #tpu.memory_space<vmem>>, vector<2x8x32xf32>
      tpu.vector_store %arg13[%c0_62, %c0_63, %c0_64], %102 {strides = array<i32>} : memref<2x8x32xf32, #tpu.memory_space<vmem>>, vector<2x8x32xf32>,
    } else {
    }
    %c0_3 = arith.constant 0 : index
    %c0_4 = arith.constant 0 : index
    %6 = vector.load %arg5[%c0_3, %c0_4] : memref<6x32xf32, #tpu.memory_space<vmem>>, vector<1x32xf32>
    %c1 = arith.constant 1 : index
    %c0_5 = arith.constant 0 : index
    %7 = vector.load %arg5[%c1, %c0_5] : memref<6x32xf32, #tpu.memory_space<vmem>>, vector<1x32xf32>
    %c2 = arith.constant 2 : index
    %c0_6 = arith.constant 0 : index
    %8 = vector.load %arg5[%c2, %c0_6] : memref<6x32xf32, #tpu.memory_space<vmem>>, vector<1x32xf32>
    %c3 = arith.constant 3 : index
    %c0_7 = arith.constant 0 : index
    %9 = vector.load %arg5[%c3, %c0_7] : memref<6x32xf32, #tpu.memory_space<vmem>>, vector<1x32xf32>
    %c4 = arith.constant 4 : index
    %c0_8 = arith.constant 0 : index
    %10 = vector.load %arg5[%c4, %c0_8] : memref<6x32xf32, #tpu.memory_space<vmem>>, vector<1x32xf32>
    %c5 = arith.constant 5 : index
    %c0_9 = arith.constant 0 : index
    %11 = vector.load %arg5[%c5, %c0_9] : memref<6x32xf32, #tpu.memory_space<vmem>>, vector<1x32xf32>
    %c0_10 = arith.constant 0 : index
    %c0_11 = arith.constant 0 : index
    %c0_12 = arith.constant 0 : index
    %12 = vector.load %arg2[%c0_10, %c0_11, %c0_12] : memref<2x32x2xi32, #tpu.memory_space<vmem>>, vector<2x32x2xi32>
    %13 = vector.extract_strided_slice %12 {offsets = [0, 0, 0], sizes = [2, 32, 1], strides = [1, 1, 1]} : vector<2x32x2xi32> to vector<2x32x1xi32>
    %14 = vector.extract_strided_slice %12 {offsets = [0, 0, 1], sizes = [2, 32, 1], strides = [1, 1, 1]} : vector<2x32x2xi32> to vector<2x32x1xi32>
    %15 = tpu.iota {dimensions = array<i32: 2>} : vector<2x32x8xi32>
    %16 = vector.broadcast %13 : vector<2x32x1xi32> to vector<2x32x8xi32>
    %17 = arith.cmpi eq, %16, %15 : vector<2x32x8xi32>
    %18 = arith.extui %17 : vector<2x32x8xi1> to vector<2x32x8xi32>
    %19 = arith.sitofp %18 : vector<2x32x8xi32> to vector<2x32x8xf32>
    %20 = vector.broadcast %14 : vector<2x32x1xi32> to vector<2x32x8xi32>
    %21 = arith.cmpi eq, %20, %15 : vector<2x32x8xi32>
    %22 = arith.extui %21 : vector<2x32x8xi1> to vector<2x32x8xi32>
    %23 = arith.sitofp %22 : vector<2x32x8xi32> to vector<2x32x8xf32>
    %c0_13 = arith.constant 0 : index
    %c0_14 = arith.constant 0 : index
    %c0_15 = arith.constant 0 : index
    %24 = vector.load %arg10[%c0_13, %c0_14, %c0_15] : memref<2x8x32xf32, #tpu.memory_space<vmem>>, vector<2x8x32xf32>
    "tpu.trace_start"() <{level = 10 : i32, message = "gen,gnh->geh"}> : () -> ()
    %cst = arith.constant dense<0.000000e+00> : vector<2x32x32xf32>
    %25 = tpu.matmul %19, %24, %cst {dimension_numbers = #tpu.dot_dimension_numbers<[2], [1], [1], [2], [0, 0, 0, 1, 1, 2], [0], [0]>} : vector<2x32x8xf32>, vector<2x8x32xf32>, vector<2x32x32xf32> -> vector<2x32x32xf32>
    "tpu.trace_stop"() : () -> ()
    %c0_16 = arith.constant 0 : index
    %c0_17 = arith.constant 0 : index
    %c0_18 = arith.constant 0 : index
    %26 = vector.load %arg11[%c0_16, %c0_17, %c0_18] : memref<2x8x32xf32, #tpu.memory_space<vmem>>, vector<2x8x32xf32>
    "tpu.trace_start"() <{level = 10 : i32, message = "gen,gnh->geh"}> : () -> ()
    %cst_19 = arith.constant dense<0.000000e+00> : vector<2x32x32xf32>
    %27 = tpu.matmul %23, %26, %cst_19 {dimension_numbers = #tpu.dot_dimension_numbers<[2], [1], [1], [2], [0, 0, 0, 1, 1, 2], [0], [0]>} : vector<2x32x8xf32>, vector<2x8x32xf32>, vector<2x32x32xf32> -> vector<2x32x32xf32>
    "tpu.trace_stop"() : () -> ()
    %28 = arith.addf %25, %27 : vector<2x32x32xf32>
    %29 = arith.subf %19, %23 : vector<2x32x8xf32>
    "tpu.trace_start"() <{level = 10 : i32, message = "gen,gnc->gec"}> : () -> ()
    %cst_20 = arith.constant dense<0.000000e+00> : vector<2x32x3xf32>
    %30 = tpu.matmul %29, %2, %cst_20 {dimension_numbers = #tpu.dot_dimension_numbers<[2], [1], [1], [2], [0, 0, 0, 1, 1, 2], [0], [0]>} : vector<2x32x8xf32>, vector<2x8x3xf32>, vector<2x32x3xf32> -> vector<2x32x3xf32>
    "tpu.trace_stop"() : () -> ()
    %31 = arith.mulf %30, %30 : vector<2x32x3xf32>
    %cst_21 = arith.constant dense<0.000000e+00> : vector<2x32xf32>
    %32 = vector.multi_reduction <add>, %31, %cst_21 [2] : vector<2x32x3xf32> to vector<2x32xf32>
    %33 = vector.shape_cast %32 : vector<2x32xf32> to vector<2x32x1xf32>
    %34 = vector.shape_cast %6 : vector<1x32xf32> to vector<1x1x32xf32>
    %35 = vector.broadcast %33 : vector<2x32x1xf32> to vector<2x32x32xf32>
    %36 = vector.broadcast %34 : vector<1x1x32xf32> to vector<2x32x32xf32>
    %37 = arith.mulf %35, %36 : vector<2x32x32xf32>
    %38 = arith.addf %28, %37 : vector<2x32x32xf32>
    %39 = vector.shape_cast %7 : vector<1x32xf32> to vector<1x1x32xf32>
    %40 = vector.broadcast %39 : vector<1x1x32xf32> to vector<2x32x32xf32>
    %41 = arith.addf %38, %40 : vector<2x32x32xf32>
    %42 = arith.negf %41 : vector<2x32x32xf32>
    %43 = math.exp %42 : vector<2x32x32xf32>
    %cst_22 = arith.constant 1.000000e+00 : f32
    %44 = vector.broadcast %cst_22 : f32 to vector<2x32x32xf32>
    %45 = arith.addf %44, %43 : vector<2x32x32xf32>
    %46 = arith.divf %44, %45 : vector<2x32x32xf32>
    %47 = arith.mulf %41, %46 : vector<2x32x32xf32>
    %48 = vector.shape_cast %47 : vector<2x32x32xf32> to vector<64x32xf32>
    %c64 = arith.constant 64 : index
    %c0_23 = arith.constant 0 : index
    %49 = vector.load %arg4[%c64, %c0_23] : memref<192x32xf32, #tpu.memory_space<vmem>>, vector<32x32xf32>
    %cst_24 = arith.constant dense<0.000000e+00> : vector<64x32xf32>
    %50 = tpu.matmul %48, %49, %cst_24 {dimension_numbers = #tpu.dot_dimension_numbers<[1], [0], [0], [1], [0, 0, 1, 1], [], []>} : vector<64x32xf32>, vector<32x32xf32>, vector<64x32xf32> -> vector<64x32xf32>
    %51 = vector.broadcast %8 : vector<1x32xf32> to vector<64x32xf32>
    %52 = arith.addf %50, %51 : vector<64x32xf32>
    %53 = arith.negf %52 : vector<64x32xf32>
    %54 = math.exp %53 : vector<64x32xf32>
    %cst_25 = arith.constant 1.000000e+00 : f32
    %55 = vector.broadcast %cst_25 : f32 to vector<64x32xf32>
    %56 = arith.addf %55, %54 : vector<64x32xf32>
    %57 = arith.divf %55, %56 : vector<64x32xf32>
    %58 = arith.mulf %52, %57 : vector<64x32xf32>
    %c96 = arith.constant 96 : index
    %c0_26 = arith.constant 0 : index
    %59 = vector.load %arg4[%c96, %c0_26] : memref<192x32xf32, #tpu.memory_space<vmem>>, vector<32x32xf32>
    %cst_27 = arith.constant dense<0.000000e+00> : vector<64x32xf32>
    %60 = tpu.matmul %58, %59, %cst_27 {dimension_numbers = #tpu.dot_dimension_numbers<[1], [0], [0], [1], [0, 0, 1, 1], [], []>} : vector<64x32xf32>, vector<32x32xf32>, vector<64x32xf32> -> vector<64x32xf32>
    %61 = vector.broadcast %9 : vector<1x32xf32> to vector<64x32xf32>
    %62 = arith.addf %60, %61 : vector<64x32xf32>
    %63 = arith.negf %62 : vector<64x32xf32>
    %64 = math.exp %63 : vector<64x32xf32>
    %cst_28 = arith.constant 1.000000e+00 : f32
    %65 = vector.broadcast %cst_28 : f32 to vector<64x32xf32>
    %66 = arith.addf %65, %64 : vector<64x32xf32>
    %67 = arith.divf %65, %66 : vector<64x32xf32>
    %68 = arith.mulf %62, %67 : vector<64x32xf32>
    %69 = vector.broadcast %10 : vector<1x32xf32> to vector<64x32xf32>
    %70 = arith.mulf %68, %69 : vector<64x32xf32>
    %cst_29 = arith.constant dense<0.000000e+00> : vector<64xf32>
    %71 = vector.multi_reduction <add>, %70, %cst_29 [1] : vector<64x32xf32> to vector<64xf32>
    %72 = vector.shape_cast %71 : vector<64xf32> to vector<64x1xf32>
    %73 = vector.shape_cast %30 : vector<2x32x3xf32> to vector<64x3xf32>
    %74 = vector.broadcast %72 : vector<64x1xf32> to vector<64x3xf32>
    %75 = arith.mulf %73, %74 : vector<64x3xf32>
    %cst_30 = arith.constant 1.000000e+00 : f32
    %76 = vector.broadcast %cst_30 : f32 to vector<2x32x1xf32>
    %77 = vector.shape_cast %75 : vector<64x3xf32> to vector<2x32x3xf32>
    %78 = tpu.concatenate %77, %76 in 2 : vector<2x32x3xf32>, vector<2x32x1xf32> -> vector<2x32x4xf32>
    %c0_31 = arith.constant 0 : index
    %c0_32 = arith.constant 0 : index
    %c0_33 = arith.constant 0 : index
    %79 = vector.load %arg12[%c0_31, %c0_32, %c0_33] : memref<2x8x4xf32, #tpu.memory_space<vmem>>, vector<2x8x4xf32>
    "tpu.trace_start"() <{level = 10 : i32, message = "gen,gec->gnc"}> : () -> ()
    %cst_34 = arith.constant dense<0.000000e+00> : vector<2x8x4xf32>
    %80 = tpu.matmul %19, %78, %cst_34 {dimension_numbers = #tpu.dot_dimension_numbers<[1], [1], [2], [2], [0, 0, 0, 2, 1, 2], [0], [0]>} : vector<2x32x8xf32>, vector<2x32x4xf32>, vector<2x8x4xf32> -> vector<2x8x4xf32>
    "tpu.trace_stop"() : () -> ()
    %81 = arith.addf %79, %80 : vector<2x8x4xf32>
    %c0_35 = arith.constant 0 : index
    %c0_36 = arith.constant 0 : index
    %c0_37 = arith.constant 0 : index
    %82 = vector.load %arg12[%c0_35, %c0_36, %c0_37] : memref<2x8x4xf32, #tpu.memory_space<vmem>>, vector<2x8x4xf32>
    tpu.vector_store %arg12[%c0_35, %c0_36, %c0_37], %81 {strides = array<i32>} : memref<2x8x4xf32, #tpu.memory_space<vmem>>, vector<2x8x4xf32>,
    %c0_38 = arith.constant 0 : index
    %c0_39 = arith.constant 0 : index
    %c0_40 = arith.constant 0 : index
    %83 = vector.load %arg13[%c0_38, %c0_39, %c0_40] : memref<2x8x32xf32, #tpu.memory_space<vmem>>, vector<2x8x32xf32>
    %84 = vector.shape_cast %58 : vector<64x32xf32> to vector<2x32x32xf32>
    "tpu.trace_start"() <{level = 10 : i32, message = "gen,geh->gnh"}> : () -> ()
    %cst_41 = arith.constant dense<0.000000e+00> : vector<2x8x32xf32>
    %85 = tpu.matmul %19, %84, %cst_41 {dimension_numbers = #tpu.dot_dimension_numbers<[1], [1], [2], [2], [0, 0, 0, 2, 1, 2], [0], [0]>} : vector<2x32x8xf32>, vector<2x32x32xf32>, vector<2x8x32xf32> -> vector<2x8x32xf32>
    "tpu.trace_stop"() : () -> ()
    %86 = arith.addf %83, %85 : vector<2x8x32xf32>
    %c0_42 = arith.constant 0 : index
    %c0_43 = arith.constant 0 : index
    %c0_44 = arith.constant 0 : index
    %87 = vector.load %arg13[%c0_42, %c0_43, %c0_44] : memref<2x8x32xf32, #tpu.memory_space<vmem>>, vector<2x8x32xf32>
    tpu.vector_store %arg13[%c0_42, %c0_43, %c0_44], %86 {strides = array<i32>} : memref<2x8x32xf32, #tpu.memory_space<vmem>>, vector<2x8x32xf32>,
    %c1_i32 = arith.constant 1 : i32
    %88 = arith.cmpi eq, %arg1, %c1_i32 : i32
    %89 = arith.extui %88 : i1 to i32
    %c0_i32_45 = arith.constant 0 : i32
    %90 = arith.cmpi ne, %89, %c0_i32_45 : i32
    scf.if %90 {
      %c0_46 = arith.constant 0 : index
      %c0_47 = arith.constant 0 : index
      %c0_48 = arith.constant 0 : index
      %91 = vector.load %arg12[%c0_46, %c0_47, %c0_48] : memref<2x8x4xf32, #tpu.memory_space<vmem>>, vector<2x8x4xf32>
      %92 = vector.extract_strided_slice %91 {offsets = [0, 0, 0], sizes = [2, 8, 3], strides = [1, 1, 1]} : vector<2x8x4xf32> to vector<2x8x3xf32>
      %93 = vector.extract_strided_slice %91 {offsets = [0, 0, 3], sizes = [2, 8, 1], strides = [1, 1, 1]} : vector<2x8x4xf32> to vector<2x8x1xf32>
      %cst_49 = arith.constant 1.000000e+00 : f32
      %94 = vector.broadcast %cst_49 : f32 to vector<2x8x1xf32>
      %95 = arith.maximumf %93, %94 : vector<2x8x1xf32>
      %96 = vector.broadcast %95 : vector<2x8x1xf32> to vector<2x8x3xf32>
      %97 = arith.divf %92, %96 : vector<2x8x3xf32>
      %98 = arith.addf %2, %97 : vector<2x8x3xf32>
      %c0_50 = arith.constant 0 : index
      %c0_51 = arith.constant 0 : index
      %c0_52 = arith.constant 0 : index
      %99 = vector.load %arg9[%c0_50, %c0_51, %c0_52] : memref<2x8x3xf32, #tpu.memory_space<vmem>>, vector<2x8x3xf32>
      tpu.vector_store %arg9[%c0_50, %c0_51, %c0_52], %98 {strides = array<i32>} : memref<2x8x3xf32, #tpu.memory_space<vmem>>, vector<2x8x3xf32>,
      %100 = vector.shape_cast %1 : vector<2x8x32xf32> to vector<16x32xf32>
      %c0_53 = arith.constant 0 : index
      %c0_54 = arith.constant 0 : index
      %c0_55 = arith.constant 0 : index
      %101 = vector.load %arg13[%c0_53, %c0_54, %c0_55] : memref<2x8x32xf32, #tpu.memory_space<vmem>>, vector<2x8x32xf32>
      %102 = vector.shape_cast %101 : vector<2x8x32xf32> to vector<16x32xf32>
      %c128 = arith.constant 128 : index
      %c0_56 = arith.constant 0 : index
      %103 = vector.load %arg4[%c128, %c0_56] : memref<192x32xf32, #tpu.memory_space<vmem>>, vector<32x32xf32>
      %cst_57 = arith.constant dense<0.000000e+00> : vector<16x32xf32>
      %104 = tpu.matmul %100, %103, %cst_57 {dimension_numbers = #tpu.dot_dimension_numbers<[1], [0], [0], [1], [0, 0, 1, 1], [], []>} : vector<16x32xf32>, vector<32x32xf32>, vector<16x32xf32> -> vector<16x32xf32>
      %c160 = arith.constant 160 : index
      %c0_58 = arith.constant 0 : index
      %105 = vector.load %arg4[%c160, %c0_58] : memref<192x32xf32, #tpu.memory_space<vmem>>, vector<32x32xf32>
      %cst_59 = arith.constant dense<0.000000e+00> : vector<16x32xf32>
      %106 = tpu.matmul %102, %105, %cst_59 {dimension_numbers = #tpu.dot_dimension_numbers<[1], [0], [0], [1], [0, 0, 1, 1], [], []>} : vector<16x32xf32>, vector<32x32xf32>, vector<16x32xf32> -> vector<16x32xf32>
      %107 = arith.addf %104, %106 : vector<16x32xf32>
      %108 = vector.broadcast %11 : vector<1x32xf32> to vector<16x32xf32>
      %109 = arith.addf %107, %108 : vector<16x32xf32>
      %110 = arith.negf %109 : vector<16x32xf32>
      %111 = math.exp %110 : vector<16x32xf32>
      %cst_60 = arith.constant 1.000000e+00 : f32
      %112 = vector.broadcast %cst_60 : f32 to vector<16x32xf32>
      %113 = arith.addf %112, %111 : vector<16x32xf32>
      %114 = arith.divf %112, %113 : vector<16x32xf32>
      %115 = arith.mulf %109, %114 : vector<16x32xf32>
      %c0_61 = arith.constant 0 : index
      %c0_62 = arith.constant 0 : index
      %116 = vector.load %arg6[%c0_61, %c0_62] : memref<32x32xf32, #tpu.memory_space<vmem>>, vector<32x32xf32>
      %cst_63 = arith.constant dense<0.000000e+00> : vector<16x32xf32>
      %117 = tpu.matmul %115, %116, %cst_63 {dimension_numbers = #tpu.dot_dimension_numbers<[1], [0], [0], [1], [0, 0, 1, 1], [], []>} : vector<16x32xf32>, vector<32x32xf32>, vector<16x32xf32> -> vector<16x32xf32>
      %c0_64 = arith.constant 0 : index
      %c0_65 = arith.constant 0 : index
      %118 = vector.load %arg7[%c0_64, %c0_65] : memref<1x32xf32, #tpu.memory_space<vmem>>, vector<1x32xf32>
      %119 = vector.broadcast %118 : vector<1x32xf32> to vector<16x32xf32>
      %120 = arith.addf %117, %119 : vector<16x32xf32>
      %121 = vector.shape_cast %120 : vector<16x32xf32> to vector<2x8x32xf32>
      %122 = arith.addf %1, %121 : vector<2x8x32xf32>
      %c0_66 = arith.constant 0 : index
      %c0_67 = arith.constant 0 : index
      %c0_68 = arith.constant 0 : index
      %123 = vector.load %arg8[%c0_66, %c0_67, %c0_68] : memref<2x8x32xf32, #tpu.memory_space<vmem>>, vector<2x8x32xf32>
      tpu.vector_store %arg8[%c0_66, %c0_67, %c0_68], %122 {strides = array<i32>} : memref<2x8x32xf32, #tpu.memory_space<vmem>>, vector<2x8x32xf32>,
    } else {
    }
    return
  }
  func.func @transform_0(%arg0: i32, %arg1: i32) -> (i32, i32, i32) {
    %c0_i32 = arith.constant 0 : i32
    %c0_i32_0 = arith.constant 0 : i32
    return %arg0, %arg1, %c0_i32 : i32, i32, i32
  }
  func.func @transform_1(%arg0: i32, %arg1: i32) -> (i32, i32, i32) {
    %c0_i32 = arith.constant 0 : i32
    %c0_i32_0 = arith.constant 0 : i32
    %c0_i32_1 = arith.constant 0 : i32
    return %arg0, %c0_i32, %c0_i32_0 : i32, i32, i32
  }
  func.func @transform_2(%arg0: i32, %arg1: i32) -> (i32, i32) {
    %c0_i32 = arith.constant 0 : i32
    %c0_i32_0 = arith.constant 0 : i32
    %c0_i32_1 = arith.constant 0 : i32
    return %c0_i32, %c0_i32_0 : i32, i32
  }
  func.func @transform_3(%arg0: i32, %arg1: i32) -> (i32, i32) {
    %c0_i32 = arith.constant 0 : i32
    %c0_i32_0 = arith.constant 0 : i32
    %c0_i32_1 = arith.constant 0 : i32
    return %c0_i32, %c0_i32_0 : i32, i32
  }
  func.func @transform_4(%arg0: i32, %arg1: i32) -> (i32, i32) {
    %c0_i32 = arith.constant 0 : i32
    %c0_i32_0 = arith.constant 0 : i32
    %c0_i32_1 = arith.constant 0 : i32
    return %c0_i32, %c0_i32_0 : i32, i32
  }
  func.func @transform_5(%arg0: i32, %arg1: i32) -> (i32, i32) {
    %c0_i32 = arith.constant 0 : i32
    %c0_i32_0 = arith.constant 0 : i32
    %c0_i32_1 = arith.constant 0 : i32
    return %c0_i32, %c0_i32_0 : i32, i32
  }
  func.func @transform_6(%arg0: i32, %arg1: i32) -> (i32, i32, i32) {
    %c0_i32 = arith.constant 0 : i32
    %c0_i32_0 = arith.constant 0 : i32
    %c0_i32_1 = arith.constant 0 : i32
    return %arg0, %c0_i32, %c0_i32_0 : i32, i32, i32
  }
  func.func @transform_7(%arg0: i32, %arg1: i32) -> (i32, i32, i32) {
    %c0_i32 = arith.constant 0 : i32
    %c0_i32_0 = arith.constant 0 : i32
    %c0_i32_1 = arith.constant 0 : i32
    return %arg0, %c0_i32, %c0_i32_0 : i32, i32, i32
  }
}

</mosaic_0001>

<bundles_post_ra>
// kernel: tpu_custom_call.1
= control target key start
LH: loop header
LB: loop body
LE: loop exit
PB: predicated region body
PF: predicated region fallthrough
CT: control target
= control target key end

     0   :  { %s4223_s0 = inlined_call_operand.vmem [shape: s32[4,64,2], index: 0, kind: input, shape index: {}]   ;;  %s4224_s1 = inlined_call_operand.vmem [shape: f32[4,8,35], index: 1, kind: input, shape index: {}]   ;;  %s4225_s2 = inlined_call_operand.vmem [shape: f32[192,32], index: 2, kind: input, shape index: {}]   ;;  %s4226_s3 = inlined_call_operand.vmem [shape: f32[6,32], index: 3, kind: input, shape index: {}]   ;;  %s4227_s4 = inlined_call_operand.vmem [shape: f32[32,32], index: 4, kind: input, shape index: {}]   ;;  %s4228_s5 = inlined_call_operand.vmem [shape: f32[1,32], index: 5, kind: input, shape index: {}]   ;;  %s4229_s6 = inlined_call_operand.hbm [shape: f32[4,8,32], index: 6, kind: output, shape index: {0}]   ;;  %s4230_s7 = inlined_call_operand.vmem [shape: f32[4,8,3], index: 7, kind: output, shape index: {1}]  }
   0x1   :  { %4235 = sst [smem:[#allocation14_spill]] %s4223_s0 }
   0x2   :  { %13 = vsyncpa [#allocation8], 0 }
   0x3   :  { %15 = vsyncpa [#allocation8 + $0x1], 0  ;;  %s3587_s24 = smov 0   ;;  %s3589_s25 = smov 0  }
   0x4   :  { %s3591_s26 = smov 0   ;;  %s3593_s27 = smov 0  }
   0x5   :  { %s3595_s28 = smov 0   ;;  %s3597_s29 = smov 0  }
   0x6   :  { %s3599_s30 = smov 0   ;;  %s3601_s8 = smov 0  }
   0x7   :  { %s3603_s9 = smov 0   ;;  %s3605_s10 = smov 0  }
   0x8 LB: > { %s2684_s11 = sadd.s32 4294967295, %s3532_s10   ;;  %s2685_s12 = sadd.s32 4294967294, %s3532_s10   ;;  %s3532_s10 = sphi %s3605_s10, %s21_s10   ;;  %s3528_s9 = sphi %s3603_s9, %s4257_s9   ;;  %s3524_s8 = sphi %s3601_s8, %s4256_s8   ;;  %s3520_s30 = sphi %s3599_s30, %s4255_s30   ;;  %s3516_s29 = sphi %s3597_s29, %s4254_s29   ;;  %s3512_s28 = sphi %s3595_s28, %s4253_s28   ;;  %s3508_s27 = sphi %s3593_s27, %s4252_s27   ;;  %s3504_s26 = sphi %s3591_s26, %s4251_s26   ;;  %s3500_s25 = sphi %s3589_s25, %s4250_s25   ;;  %s3496_s24 = sphi %s3587_s24, %s4249_s24  }
   0x9   : > { %s30_s13 = sadd.s32 1, %s3524_s8  ;;  %s33_s14 = sadd.s32 1, %s3528_s9 }
   0xa   : > { %p31_p0 = scmp.ge.s32.totalorder %s30_s13, 2  ;;  %s42_s15 = sadd.s32 1, %s3512_s28 }
   0xb   : > { %p49_p1 = scmp.ne.s32.totalorder %s3512_s28, %s3508_s27  ;;  %p50_p2 = scmp.eq.s32.totalorder %s3532_s10, 0 }
   0xc   : > { %s4259_s13 = smov (%p31_p0, %s30_s13), 0  ;;  %s4261_s14 = smov (!%p31_p0, %s33_s14), %s3528_s9 }
   0xd   : > { %4236 = sst [smem:[#allocation10_spill]] %s4259_s13  ;;  %s38_s16 = ssub.s32 %s3524_s8, %s4259_s13 }
   0xe   : > { %p3650_p3 = por %p50_p2, %p49_p1  ;;  %p35_p4 = scmp.ge.s32.totalorder %s4261_s14, 2 }
   0xf   : > { %s178_s18 = sadd.s32 1, %s3504_s26  ;;  %p188_p5 = scmp.ne.s32.totalorder %s3504_s26, %s3500_s25 }
  0x10   : > { %p189_p6 = scmp.eq.s32.totalorder %s2684_s11, 3  ;;  %s4263_s14 = smov (%p35_p4, %s4261_s14), 0 }
  0x11   : > { %4238 = sst [smem:[#allocation11_spill]] %s4263_s14  ;;  %p194_p8 = scmp.ne.s32.totalorder %s3500_s25, %s3496_s24 }
  0x12   : > { %p3659_p7 = por %p189_p6, %p188_p5  ;;  %s37_s20 = ssub.s32 %s3528_s9, %s4263_s14 }
  0x13   : > { %p195_p9 = scmp.eq.s32.totalorder %s2685_s12, 3  ;;  %s39_s21 = sor.u32 %s38_s16, %s37_s20 }
  0x14   : > { %p176_p10 = scmp.eq.s32.totalorder %s37_s20, 0  ;;  %p40_p11 = scmp.eq.s32.totalorder %s39_s21, 0 }
  0x15   : > { %p3667_p12 = por %p195_p9, %p194_p8  ;;  %p2687_p13 = scmp.ge.s32.totalorder %s3532_s10, 4 }
  0x16   : > { %s3672_s23 = scalar_select %p176_p10, %s3504_s26, %s178_s18  }
  0x17   : > { %s4240_s22 = scalar_select %p3667_p12, 1, 0 }
  0x18   : > { %s3675_s11 = scalar_select %p40_p11, %s3512_s28, %s42_s15  }
  0x19   : > { %4241 = sst [smem:[#allocation12_spill]] %s4240_s22  ;;  %249 = sbr.rel (%p2687_p13) target bundleno = 46 (0x2e), region = 32 }
  0x1a   : > { %4242 = sst [smem:[#allocation13_spill]] %s3675_s11 }
  0x20   : > { %252 = sbr.rel (!%p3650_p3) target bundleno = 46 (0x2e), region = 36  ;;  %s254_s12 = sand.u32 (%p3650_p3), 1, %s3512_s28  }
  0x21   : > { %s2690_s16 = sshll.u32 (%p3650_p3), %s3524_s8, 2  ;;  %s2688_s20 = sshll.u32 (%p3650_p3), %s254_s12, 6 }
  0x22   : > { %s2810_s21 = sshll.u32 (%p3650_p3), %s3528_s9, 4  ;;  %s4243_s0 = sld [smem:[#allocation14_spill]] (%p3650_p3) }
  0x23   : > { %s260_s14 = sadd.s32 (%p3650_p3), %s2810_s21, %s2690_s16  ;;  %s256_s11 = scalar_lea.vmem (%p3650_p3), [#allocation6], %s2688_s20 }
  0x24   : > { %s2692_s13 = sshll.u32 (%p3650_p3), %s260_s14, 3 }
  0x28   : > { %s262_s15 = scalar_lea.vmem %s4243_s0, %s2692_s13 }
  0x29   : > { %v304_v0 = vld [vmem:[%s262_s15] sm:$0xff]  ;;  %v306_v1 = vld [vmem:[%s262_s15 + $0x8] sm:$0xff]  ;;  %v308_v2 = vld [vmem:[%s262_s15 + $0x10] sm:$0xff] }
  0x2a   : > { %305 = vst [vmem:[%s256_s11] sm:$0xff] %v304_v0  ;;  %307 = vst [vmem:[%s256_s11 + $0x8] sm:$0xff] %v306_v1  ;;  %v310_v3 = vld [vmem:[%s262_s15 + $0x18] sm:$0xff]  ;;  %v312_v4 = vld [vmem:[%s262_s15 + $0x40] sm:$0xff] }
  0x2b   : > { %309 = vst [vmem:[%s256_s11 + $0x10] sm:$0xff] %v308_v2  ;;  %v314_v5 = vld [vmem:[%s262_s15 + $0x48] sm:$0xff]  ;;  %311 = vst [vmem:[%s256_s11 + $0x18] sm:$0xff] %v310_v3  ;;  %v316_v6 = vld [vmem:[%s262_s15 + $0x50] sm:$0xff] }
  0x2c   : > { %313 = vst [vmem:[%s256_s11 + $0x20] sm:$0xff] %v312_v4  ;;  %315 = vst [vmem:[%s256_s11 + $0x28] sm:$0xff] %v314_v5  ;;  %v318_v7 = vld [vmem:[%s262_s15 + $0x58] sm:$0xff] }
  0x2d   : > { %317 = vst [vmem:[%s256_s11 + $0x30] sm:$0xff] %v316_v6  ;;  %319 = vst [vmem:[%s256_s11 + $0x38] sm:$0xff] %v318_v7 }
  0x2e PF: > { %p2693_p0 = scmp.ge.s32.totalorder %s3532_s10, 1  ;;  %p333_p1 = scmp.lt.s32.totalorder %s3532_s10, 5 }
  0x30   : > { %p334_p2 = pnand %p2693_p0, %p333_p1 }
  0x31   : > { %s340_s13 = sand.u32 (!%p334_p2), 1, %s3508_s27   ;;  %s4234_s14 = sand.u32 (!%p334_p2), 1, %s3500_s25  }
  0x32   : > { %337 = sbr.rel (%p334_p2) target bundleno = 2256 (0x8d0), region = 78  ;;  %s2694_s17 = sshll.u32 (!%p334_p2), %s340_s13, 6 }
  0x33   : > { %s2695_s22 = sshll.u32 (!%p334_p2), %s4234_s14, 4  ;;  %s2696_s12 = sshll.u32 (!%p334_p2), %s3520_s30, 1 }
  0x34   : > { %p384_p3 = scmp.lt.s32.totalorder (!%p334_p2), %s2696_s12, 3  ;;  %s3705_s27 = scalar_lea.vmem (!%p334_p2), [#allocation6], %s2694_s17 }
  0x35   : > { %s3707_s13 = scalar_lea.vmem (!%p334_p2), [#allocation7], %s2695_s22  ;;  %p2700_p4 = scmp.ne.s32.totalorder (!%p334_p2), %s3516_s29, 0 }
  0x39   : > { %s4265_s12 = smov (!%p384_p3, %s2696_s12), 3  ;;  %401 = sbr.rel (%p2700_p4) target bundleno = 284 (0x11c), region = 86 }
  0x3a   : > { %s2697_s11 = sshll.u32 %s4265_s12, 3  ;;  %v402_v10 = vld [vmem:[%s4225_s2] sm:$0xff] (!%p2700_p4)  ;;  %v403_v11 = vld [vmem:[%s4225_s2 + $0x8] sm:$0xff] (!%p2700_p4)  ;;  %vm406_vm0 = vcmask (!%p2700_p4), 261120   ;;  %vm571_vm1 = vcmask (!%p2700_p4), 31744   ;;  %v404_v15 = vld [vmem:[%s4225_s2 + $0x10] sm:$0xff] (!%p2700_p4) }
  0x3b   : > { %s387_s21 = scalar_lea.vmem %s4224_s1, %s2697_s11  ;;  %s3699_s0 = scalar_lea.vmem %s4230_s7, %s2697_s11  ;;  %v490_v12 = vld [vmem:[%s4225_s2 + $0x20] sm:$0xff] (!%p2700_p4)  ;;  %v3103_v13 = vpack.c.bf16 (!%p2700_p4), %v403_v11, %v402_v10  ;;  %v491_v14 = vld [vmem:[%s4225_s2 + $0x28] sm:$0xff] (!%p2700_p4)  ;;  %v405_v16 = vld [vmem:[%s4225_s2 + $0x18] sm:$0xff] (!%p2700_p4)  ;;  %v3534_v17 = vmov (!%p2700_p4), 0.0  }
  0x3c   : > { %v3701_v8 = vld [vmem:[%s387_s21] sm:$0xff]  ;;  %v3703_v9 = vld [vmem:[%s387_s21 + $0x8] sm:$0xff]  ;;  %572 = vst.msk [vmem:[#allocation4] sm:$0xff] (!%p2700_p4), %vm571_vm1, %v3534_v17  ;;  %573 = vst.msk [vmem:[#allocation4 + $0x8] sm:$0xff] (!%p2700_p4), %vm571_vm1, %v3534_v17  ;;  %v3111_v18 = vpack.c.bf16 (!%p2700_p4), %v491_v14, %v490_v12  ;;  %v3107_v19 = vpack.c.bf16 (!%p2700_p4), %v405_v16, %v404_v15 }
  0x3d   : > { %2924 = vmatprep.mubr.msk.f32.mxu0 (!%p2700_p4), %vm406_vm0, %v3701_v8  ;;  %574 = vst.msk [vmem:[#allocation5] sm:$0xff] (!%p2700_p4), %vm406_vm0, %v3534_v17  ;;  %575 = vst.msk [vmem:[#allocation5 + $0x8] sm:$0xff] (!%p2700_p4), %vm406_vm0, %v3534_v17  ;;  %2935 = vmatprep.mubr.msk.f32.mxu1 (!%p2700_p4), %vm406_vm0, %v3701_v8  ;;  %v492_v20 = vld [vmem:[%s4225_s2 + $0x30] sm:$0xff] (!%p2700_p4)  ;;  %v493_v21 = vld [vmem:[%s4225_s2 + $0x38] sm:$0xff] (!%p2700_p4) }
  0x3e   : > { %3104 = vmatprep.subr.bf16.mxu0 (!%p2700_p4), %v3103_v13  ;;  %v3115_v22 = vpack.c.bf16 (!%p2700_p4), %v493_v21, %v492_v20  ;;  %3112 = vmatprep.subr.bf16.mxu1 (!%p2700_p4), %v3111_v18 }
  0x3f   : > { %3106 = vmatpush3.bf16.msra.mxu0 (!%p2700_p4), %v3103_v13  ;;  %3114 = vmatpush3.bf16.msra.mxu1 (!%p2700_p4), %v3111_v18 }
  0x40   : > { %3108 = vmatprep.subr.bf16.mxu0 %v3107_v19  ;;  %3116 = vmatprep.subr.bf16.mxu1 %v3115_v22 }
  0x43   : > { %3110 = vmatpush3.bf16.msra.mxu0 %v3107_v19  ;;  %3118 = vmatpush3.bf16.msra.mxu1 %v3115_v22 }
  0x46   : > { %2925 = vmatmul.mubr.msk.f32.vlgmr.msra.gmra.mrb[0].mxu0 %vm406_vm0, %v3703_v9  ;;  %2936 = vmatmul.mubr.msk.f32.vlgmr.msra.gmra.mrb[0].mxu1 %vm406_vm0, %v3703_v9 }
 0x119   : > { %v2926_v23 = vpop.f32.mrb[0].mxu0  ;;  %v2937_v24 = vpop.f32.mrb[0].mxu1 }
 0x11a   : > { %489 = vst.msk [vmem:[#allocation2 + $0x8] sm:$0xff] %vm406_vm0, %v2926_v23  ;;  %v479_v25 = vpop.f32.mrb[1].mxu0  ;;  %570 = vst.msk [vmem:[#allocation3 + $0x8] sm:$0xff] %vm406_vm0, %v2937_v24  ;;  %v560_v26 = vpop.f32.mrb[1].mxu1 }
 0x11b   : > { %488 = vst.msk [vmem:[#allocation2] sm:$0xff] %vm406_vm0, %v479_v25  ;;  %569 = vst.msk [vmem:[#allocation3] sm:$0xff] %vm406_vm0, %v560_v26 }
 0x11c PF: > { %v584_v27 = vld [vmem:[%s3705_s27 + $0x10] sm:$0xff]  ;;  %v582_v28 = vld [vmem:[%s3705_s27] sm:$0xff]  ;;  %v3535_v29 = vmov 1   ;;  %v3536_v30 = vmov 0   ;;  %v585_v31 = vld [vmem:[%s3705_s27 + $0x18] sm:$0xff]  ;;  %s3537_s21 = smov 96   ;;  %v590_v42 = vlaneseq }
 0x11d   : > { %3292 = vset.pattern.permute.xlu1 %v3535_v29  ;;  %3293 = vset.pattern.permute.xlu0 %v3536_v30  ;;  %v586_v32 = vld [vmem:[%s3705_s27 + $0x20] sm:$0xff]  ;;  %v583_v33 = vld [vmem:[%s3705_s27 + $0x8] sm:$0xff]  ;;  %v588_v39 = vld [vmem:[%s3705_s27 + $0x30] sm:$0xff]  ;;  %vm692_vm2 = vcmask 64512   ;;  %v3538_v48 = vmov 0.0   ;;  %p2794_p5 = scmp.ne.s32.totalorder %s3516_s29, 1 }
 0x11e   : > { %647 = vperm.xlu1 %3292, %v584_v27   ;;  %593 = vperm.xlu0 %3293, %v582_v28   ;;  %v587_v35 = vld [vmem:[%s3705_s27 + $0x28] sm:$0xff]  ;;  %v3759_v36 = vld [vmem:[%s4226_s3 + $0x5] ss:$0 sm:$0xff]  ;;  %v589_v40 = vld [vmem:[%s3705_s27 + $0x38] sm:$0xff]  ;;  %v3766_v45 = vand.u32 127, %v590_v42  ;;  %s3542_s16 = smov (!%p2794_p5), 32  }
 0x11f   : > { %s3543_s20 = smov (!%p2794_p5), 96  }
 0x121   : > { %v691_v38 = vld [vmem:[#allocation3 + $0x8] sm:$0xff]  ;;  %v689_v41 = vld [vmem:[#allocation2 + $0x8] sm:$0xff] }
 0x122   : > { %650 = vperm.xlu1 %3292, %v585_v31   ;;  %3294 = vset.pattern.permute.xlu0 %v3535_v29  ;;  %v690_v34 = vld [vmem:[#allocation3] sm:$0xff]  ;;  %v688_v37 = vld [vmem:[#allocation2] sm:$0xff] }
 0x123   : > { %641 = vperm.xlu0 %3294, %v582_v28   ;;  %2938 = vmatprep.subr.mxu0 %v690_v34 }
 0x124   : > { %2939 = vmatpush3.msra.mxu0 %v690_v34  ;;  %2946 = vmatprep.subr.mxu1 %v691_v38 }
 0x125   : > { %2954 = vmatprep.subr.mxu0 %v688_v37  ;;  %2947 = vmatpush3.msra.mxu1 %v691_v38 }
 0x126   : > { %653 = vperm.xlu1 %3292, %v586_v32   ;;  %2962 = vmatprep.subr.mxu1 %v689_v41 }
 0x127   : > { %644 = vperm.xlu0 %3294, %v583_v33  }
 0x12a   : > { %3295 = vset.pattern.permute.xlu1 %v3536_v30 }
 0x12b   : > { %596 = vperm.xlu1 %3295, %v583_v33   ;;  %656 = vperm.xlu0 %3294, %v587_v35  }
 0x12f   : > { %599 = vperm.xlu1 %3295, %v584_v27   ;;  %3297 = vset.pattern.permute.xlu0 %v3536_v30 }
 0x130   : > { %602 = vperm.xlu0 %3297, %v585_v31  }
 0x133   : > { %3296 = vset.pattern.permute.xlu1 %v3535_v29 }
 0x134   : > { %659 = vperm.xlu1 %3296, %v588_v39   ;;  %608 = vperm.xlu0 %3297, %v587_v35  }
 0x138   : > { %662 = vperm.xlu1 %3296, %v589_v40   ;;  %614 = vperm.xlu0 %3297, %v589_v40  }
 0x13c   : > { %3298 = vset.pattern.permute.xlu1 %v3536_v30  ;;  %1191 = vrot.lane.b32.xlu0 %v3703_v9, %s3537_s21 }
 0x13d   : > { %605 = vperm.xlu1 %3298, %v586_v32  }
 0x141   : > { %611 = vperm.xlu1 %3298, %v588_v39  }
 0x145   : > { %1090 = vrot.lane.b32.xlu1 %v3701_v8, %s3537_s21 }
 0x19d   : > { %v648_v43 = vpop.permute.xlu1 %647  ;;  %v594_v44 = vpop.permute.xlu0 %593 }
 0x19e   : > { %vm666_vm4 = vcmp.eq.s32.totalorder %v648_v43, %v3766_v45  ;;  %vm616_vm7 = vcmp.eq.s32.totalorder %v594_v44, %v3766_v45 }
 0x19f   : > { %v3784_v54 = vsel %vm666_vm4, 1.0, %v3538_v48  ;;  %v3792_v57 = vsel %vm616_vm7, 1.0, %v3538_v48  ;;  %vm1299_vm4 = vcmask 23552  }
 0x1a1   : > { %v651_v46 = vpop.permute.xlu1 %650 }
 0x1a2   : > { %v642_v47 = vpop.permute.xlu0 %641  ;;  %vm667_vm8 = vcmp.eq.s32.totalorder %v651_v46, %v3766_v45 }
 0x1a3   : > { %vm664_vm3 = vcmp.eq.s32.totalorder %v642_v47, %v3766_v45  ;;  %v3796_v58 = vsel %vm667_vm8, 1.0, %v3538_v48 }
 0x1a4   : > { %v2713_v49 = vsel %vm664_vm3, 1.0, %v3538_v48 }
 0x1a5   : > { %v654_v50 = vpop.permute.xlu1 %653  ;;  %2940 = vmatprep.mubr.msk.f32.mxu0 %vm692_vm2, %v2713_v49  ;;  %v1081_v2 = vsub.f32 %v3792_v57, %v2713_v49 }
 0x1a6   : > { %vm668_vm5 = vcmp.eq.s32.totalorder %v654_v50, %v3766_v45  ;;  %v645_v51 = vpop.permute.xlu0 %644 }
 0x1a7   : > { %vm665_vm6 = vcmp.eq.s32.totalorder %v645_v51, %v3766_v45  ;;  %v3775_v52 = vsel %vm668_vm5, 1.0, %v3538_v48  ;;  %vm3540_vm5 = vmmov 0  }
 0x1a8   : > { %v3779_v53 = vsel %vm665_vm6, 1.0, %v3538_v48  ;;  %2948 = vmatprep.mubr.msk.f32.mxu1 %vm692_vm2, %v3775_v52  ;;  %vm2065_vm6 = vcmask 31744  }
 0x1a9   : > { %2941 = vmatmul.mubr.msk.f32.vlgmr.msra.gmra.mrb[0].mxu0 %vm692_vm2, %v3779_v53 }
 0x1aa   : > { %v597_v55 = vpop.permute.xlu1 %596  ;;  %2943 = vmatprep.mubr.msk.f32.mxu0 %vm692_vm2, %v3784_v54  ;;  %v657_v56 = vpop.permute.xlu0 %656  ;;  %2955 = vmatpush3.msra.mxu0 %v688_v37 }
 0x1ab   : > { %vm669_vm9 = vcmp.eq.s32.totalorder %v657_v56, %v3766_v45  ;;  %vm617_vm10 = vcmp.eq.s32.totalorder %v597_v55, %v3766_v45 }
 0x1ac   : > { %v2718_v59 = vsel %vm669_vm9, 1.0, %v3538_v48  ;;  %v3807_v62 = vsel %vm617_vm10, 1.0, %v3538_v48 }
 0x1ad   : > { %2944 = vmatmul.mubr.msk.f32.gmra.mrb[2].mxu0 %vm692_vm2, %v3796_v58  ;;  %2949 = vmatmul.mubr.msk.f32.vlgmr.msra.gmra.mrb[0].mxu1 %vm692_vm2, %v2718_v59  ;;  %v1082_v23 = vsub.f32 %v3807_v62, %v3779_v53 }
 0x1ae   : > { %v600_v60 = vpop.permute.xlu1 %599  ;;  %2956 = vmatprep.mubr.msk.f32.mxu0 %vm692_vm2, %v3792_v57  ;;  %2963 = vmatpush3.msra.mxu1 %v689_v41 }
 0x1af   : > { %vm618_vm11 = vcmp.eq.s32.totalorder %v600_v60, %v3766_v45  ;;  %v603_v61 = vpop.permute.xlu0 %602 }
 0x1b0   : > { %v3810_v63 = vsel %vm618_vm11, 1.0, %v3538_v48  ;;  %vm619_vm12 = vcmp.eq.s32.totalorder %v603_v61, %v3766_v45 }
 0x1b1   : > { %2957 = vmatmul.mubr.msk.f32.vlgmr.msra.gmra.mrb[0].mxu0 %vm692_vm2, %v3807_v62  ;;  %v3819_v3 = vsel %vm619_vm12, 1.0, %v3538_v48  ;;  %v1083_v24 = vsub.f32 %v3810_v63, %v3784_v54 }
 0x1b2   : > { %2959 = vmatprep.mubr.msk.f32.mxu0 %vm692_vm2, %v3810_v63  ;;  %v1084_v27 = vsub.f32 %v3819_v3, %v3796_v58 }
 0x1b3   : > { %v660_v0 = vpop.permute.xlu1 %659  ;;  %v609_v1 = vpop.permute.xlu0 %608 }
 0x1b4   : > { %vm670_vm13 = vcmp.eq.s32.totalorder %v660_v0, %v3766_v45  ;;  %vm621_vm14 = vcmp.eq.s32.totalorder %v609_v1, %v3766_v45 }
 0x1b5   : > { %v2719_v4 = vsel %vm670_vm13, 1.0, %v3538_v48  ;;  %v3825_v5 = vsel %vm621_vm14, 1.0, %v3538_v48  ;;  %2960 = vmatmul.mubr.msk.f32.gmra.mrb[2].mxu0 %vm692_vm2, %v3819_v3 }
 0x1b6   : > { %v3301_v6 = vpack.i.bf16 %v3825_v5, %v3807_v62  ;;  %2951 = vmatprep.mubr.msk.f32.mxu1 %vm692_vm2, %v2719_v4  ;;  %2972 = vmatprep.mubr.msk.f32.mxu0 %vm692_vm2, %v1081_v2  ;;  %v1086_v25 = vsub.f32 %v3825_v5, %v2718_v59 }
 0x1b7   : > { %v663_v7 = vpop.permute.xlu1 %662  ;;  %v615_v10 = vpop.permute.xlu0 %614 }
 0x1b8   : > { %vm671_vm15 = vcmp.eq.s32.totalorder %v663_v7, %v3766_v45  ;;  %vm623_vm0 = vcmp.eq.s32.totalorder %v615_v10, %v3766_v45  ;;  %v1413_v7 = vld [vmem:[%s4225_s2 + $0x48] sm:$0xff] }
 0x1b9   : > { %v2720_v11 = vsel %vm671_vm15, 1.0, %v3538_v48  ;;  %v3837_v12 = vsel %vm623_vm0, 1.0, %v3538_v48 }
 0x1ba   : > { %v3305_v13 = vpack.i.bf16 %v3837_v12, %v3819_v3  ;;  %2952 = vmatmul.mubr.msk.f32.gmra.mrb[2].mxu1 %vm692_vm2, %v2720_v11  ;;  %v1088_v28 = vsub.f32 %v3837_v12, %v2720_v11  ;;  %v1414_v11 = vld [vmem:[%s4225_s2 + $0x50] sm:$0xff] }
 0x1bb   : > { %v1192_v14 = vpop.permute.xlu0 %1191 }
 0x1bc   : > { %v606_v15 = vpop.permute.xlu1 %605  ;;  %2978 = vmatprep.subr.mxu1 %v1192_v14 }
 0x1bd   : > { %vm620_vm1 = vcmp.eq.s32.totalorder %v606_v15, %v3766_v45 }
 0x1be   : > { %v3844_v16 = vsel %vm620_vm1, 1.0, %v3538_v48 }
 0x1bf   : > { %v3299_v17 = vpack.i.bf16 %v3844_v16, %v3792_v57  ;;  %2964 = vmatprep.mubr.msk.f32.mxu1 %vm692_vm2, %v3844_v16  ;;  %v1085_v20 = vsub.f32 %v3844_v16, %v3775_v52 }
 0x1c0   : > { %v612_v18 = vpop.permute.xlu1 %611  ;;  %2965 = vmatmul.mubr.msk.f32.vlgmr.msra.gmra.mrb[0].mxu1 %vm692_vm2, %v3825_v5 }
 0x1c1   : > { %vm622_vm3 = vcmp.eq.s32.totalorder %v612_v18, %v3766_v45  ;;  %2979 = vmatpush3.msra.mxu1 %v1192_v14  ;;  %v1415_v14 = vld [vmem:[%s4225_s2 + $0x58] sm:$0xff]  ;;  %v2745_v18 = vld [vmem:[%s4226_s3] ss:$0 sm:$0xff] }
 0x1c2   : > { %v3854_v19 = vsel %vm622_vm3, 1.0, %v3538_v48  ;;  %v3123_v15 = vpack.c.bf16 %v1415_v14, %v1414_v11 }
 0x1c3   : > { %v3303_v21 = vpack.i.bf16 %v3854_v19, %v3810_v63  ;;  %2967 = vmatprep.mubr.msk.f32.mxu1 %vm692_vm2, %v3854_v19  ;;  %v1087_v26 = vsub.f32 %v3854_v19, %v2719_v4  ;;  %v1412_v4 = vld [vmem:[%s4225_s2 + $0x40] sm:$0xff] }
 0x1c4   : > { %v1091_v22 = vpop.permute.xlu1 %1090  ;;  %2968 = vmatmul.mubr.msk.f32.gmra.mrb[2].mxu1 %vm692_vm2, %v3837_v12  ;;  %v3119_v10 = vpack.c.bf16 %v1413_v7, %v1412_v4 }
 0x1c5   : > { %2970 = vmatprep.subr.mxu0 %v1091_v22  ;;  %2980 = vmatprep.mubr.msk.f32.mxu1 %vm692_vm2, %v1085_v20 }
 0x1c6   : > { %2971 = vmatpush3.msra.mxu0 %v1091_v22 }
 0x1c7   : > { %2973 = vmatmul.mubr.msk.f32.vlgmr.msra.gmra.mrb[4].mxu0 %vm692_vm2, %v1082_v23  ;;  %3120 = vmatprep.subr.bf16.mxu0 %v3119_v10 }
 0x1c8   : > { %2975 = vmatprep.mubr.msk.f32.mxu0 %vm692_vm2, %v1083_v24  ;;  %2981 = vmatmul.mubr.msk.f32.vlgmr.msra.gmra.mrb[4].mxu1 %vm692_vm2, %v1086_v25  ;;  %v2746_v24 = vld [vmem:[%s4226_s3 + $0x1] ss:$0 sm:$0xff] }
 0x1c9   : > { %2983 = vmatprep.mubr.msk.f32.mxu1 %vm692_vm2, %v1087_v26  ;;  %3122 = vmatpush3.bf16.msra.mxu0 %v3119_v10 }
 0x1ca   : > { %3124 = vmatprep.subr.bf16.mxu0 %v3123_v15 }
 0x1cb   : > { %2976 = vmatmul.mubr.msk.f32.gmra.mrb[6].mxu0 %vm692_vm2, %v1084_v27 }
 0x1cc   : > { %2984 = vmatmul.mubr.msk.f32.gmra.mrb[6].mxu1 %vm692_vm2, %v1088_v28  ;;  %vm1420_vm2 = vcmask 261120  }
 0x1cd   : > { %3126 = vmatpush3.bf16.msra.mxu0 %v3123_v15 }
 0x284   : > { %v2958_v30 = vpop.f32.mrb[0].mxu0 }
 0x285   : > { %v965_v31 = vpop.f32.mrb[1].mxu0 }
 0x288   : > { %v3880_v32 = vpop.f32.mrb[2].mxu0 }
 0x289   : > { %v3882_v33 = vpop.f32.mrb[3].mxu0 }
 0x293   : > { %v3884_v34 = vpop.f32.mrb[0].mxu1 }
 0x294   : > { %v3886_v35 = vpop.f32.mrb[1].mxu1 }
 0x297   : > { %v3888_v37 = vpop.f32.mrb[2].mxu1 }
 0x298   : > { %v3890_v38 = vpop.f32.mrb[3].mxu1 }
 0x29a   : > { %v3892_v39 = vpop.f32.mrb[4].mxu0 }
 0x29b   : > { %v1292_v40 = vmul.f32 %v3892_v39, %v3892_v39  ;;  %v3896_v41 = vpop.f32.mrb[5].mxu0  ;;  %v3898_v42 = vpop.f32.mrb[4].mxu1 }
 0x29c   : > { %v1291_v43 = vmul.f32 %v3896_v41, %v3896_v41  ;;  %v3902_v44 = vpop.f32.mrb[5].mxu1  ;;  %v1296_v55 = vmul.f32 %v3898_v42, %v3898_v42 }
 0x29d   : > { %v1303_v45 = vsel %vm1299_vm4, %v1292_v40, 0.0  ;;  %v1295_v56 = vmul.f32 %v3902_v44, %v3902_v44 }
 0x29e   : > { %1304 = vadd.xlane.f32.xlu0 %v1303_v45  ;;  %v3905_v46 = vpop.f32.mrb[6].mxu0  ;;  %v1300_v47 = vsel %vm1299_vm4, %v1291_v43, 0.0  ;;  %v1315_v61 = vsel %vm1299_vm4, %v1296_v55, 0.0 }
 0x29f   : > { %v1294_v49 = vmul.f32 %v3905_v46, %v3905_v46  ;;  %1301 = vadd.xlane.f32.xlu1 %v1300_v47  ;;  %v3910_v50 = vpop.f32.mrb[7].mxu0  ;;  %v3912_v51 = vpop.f32.mrb[6].mxu1  ;;  %v1312_v0 = vsel %vm1299_vm4, %v1295_v56, 0.0 }
 0x2a0   : > { %v1293_v52 = vmul.f32 %v3910_v50, %v3910_v50  ;;  %v3916_v53 = vpop.f32.mrb[7].mxu1  ;;  %v1298_v59 = vmul.f32 %v3912_v51, %v3912_v51 }
 0x2a1   : > { %v1309_v54 = vsel %vm1299_vm4, %v1294_v49, 0.0  ;;  %v1297_v60 = vmul.f32 %v3916_v53, %v3916_v53 }
 0x2a2   : > { %v1306_v58 = vsel %vm1299_vm4, %v1293_v52, 0.0  ;;  %v1321_v1 = vsel %vm1299_vm4, %v1298_v59, 0.0 }
 0x2a3   : > { %1310 = vadd.xlane.f32.xlu1 %v1309_v54  ;;  %1307 = vadd.xlane.f32.xlu0 %v1306_v58  ;;  %v1318_v2 = vsel %vm1299_vm4, %v1297_v60, 0.0 }
 0x2a7   : > { %1316 = vadd.xlane.f32.xlu1 %v1315_v61  ;;  %1313 = vadd.xlane.f32.xlu0 %v1312_v0 }
 0x2ab   : > { %1322 = vadd.xlane.f32.xlu1 %v1321_v1  ;;  %1319 = vadd.xlane.f32.xlu0 %v1318_v2 }
 0x32b   : > { %v1305_v20 = vpop.xlane.xlu0 %1304 }
 0x32c   : > { %v1329_v22 = vmul.f32 %v2745_v18, %v1305_v20  ;;  %v1302_v23 = vpop.xlane.xlu1 %1301 }
 0x32d   : > { %v1328_v25 = vmul.f32 %v2745_v18, %v1302_v23 }
 0x32e   : > { %v1337_v26 = vadd.f32 %v2958_v30, %v1329_v22 }
 0x32f   : > { %v1336_v27 = vadd.f32 %v1328_v25, %v965_v31 }
 0x330   : > { %v3950_v28 = vadd.f32 %v2746_v24, %v1337_v26  ;;  %v1311_v40 = vpop.xlane.xlu1 %1310  ;;  %v1308_v43 = vpop.xlane.xlu0 %1307 }
 0x331   : > { %v1348_v45 = vadd.f32 %v2746_v24, %v1336_v27  ;;  %v1331_v47 = vmul.f32 %v2745_v18, %v1311_v40  ;;  %v1330_v49 = vmul.f32 %v2745_v18, %v1308_v43 }
 0x332   : > { %v2748_v52 = vmul.f32 -1.442695, %v3950_v28 }
 0x333   : > { %v2747_v54 = vmul.f32 -1.442695, %v1348_v45  ;;  %v1339_v55 = vadd.f32 %v3880_v32, %v1331_v47  ;;  %v1338_v56 = vadd.f32 %v1330_v49, %v3882_v33 }
 0x334   : > { %3313 = vpow2.f32 %v2748_v52  ;;  %v1317_v58 = vpop.xlane.xlu1 %1316  ;;  %v1314_v59 = vpop.xlane.xlu0 %1313 }
 0x335   : > { %3315 = vpow2.f32 %v2747_v54  ;;  %v1351_v30 = vadd.f32 %v2746_v24, %v1339_v55  ;;  %v1350_v31 = vadd.f32 %v2746_v24, %v1338_v56  ;;  %v1333_v60 = vmul.f32 %v2745_v18, %v1317_v58 }
 0x336   : > { %v1332_v61 = vmul.f32 %v2745_v18, %v1314_v59 }
 0x337   : > { %v2750_v0 = vmul.f32 -1.442695, %v1351_v30  ;;  %v2749_v1 = vmul.f32 -1.442695, %v1350_v31  ;;  %v1341_v2 = vadd.f32 %v3884_v34, %v1333_v60 }
 0x338   : > { %v1340_v4 = vadd.f32 %v1332_v61, %v3886_v35  ;;  %v1323_v7 = vpop.xlane.xlu1 %1322  ;;  %v1320_v10 = vpop.xlane.xlu0 %1319 }
 0x339   : > { %3317 = vpow2.f32 %v2750_v0  ;;  %v1353_v32 = vadd.f32 %v2746_v24, %v1341_v2  ;;  %v1335_v11 = vmul.f32 %v2745_v18, %v1323_v7  ;;  %v1334_v33 = vmul.f32 %v2745_v18, %v1320_v10 }
 0x33a   : > { %3319 = vpow2.f32 %v2749_v1  ;;  %v1352_v14 = vadd.f32 %v2746_v24, %v1340_v4 }
 0x33b   : > { %v2752_v15 = vmul.f32 -1.442695, %v1353_v32  ;;  %v1343_v20 = vadd.f32 %v3888_v37, %v1335_v11  ;;  %v1342_v22 = vadd.f32 %v1334_v33, %v3890_v38 }
 0x33c   : > { %v2751_v23 = vmul.f32 -1.442695, %v1352_v14 }
 0x33d   : > { %3321 = vpow2.f32 %v2752_v15  ;;  %v1355_v25 = vadd.f32 %v2746_v24, %v1343_v20  ;;  %v1354_v26 = vadd.f32 %v2746_v24, %v1342_v22 }
 0x33e   : > { %v3314_v34 = vpop.eup %3313  ;;  %3323 = vpow2.f32 %v2751_v23 }
 0x33f   : > { %v3316_v35 = vpop.eup %3315  ;;  %v1381_v27 = vadd.f32 1.0, %v3314_v34  ;;  %v2754_v40 = vmul.f32 -1.442695, %v1355_v25  ;;  %v2753_v47 = vmul.f32 -1.442695, %v1354_v26 }
 0x340   : > { %v1380_v43 = vadd.f32 1.0, %v3316_v35  ;;  %v2755_v35 = vld [vmem:[%s4226_s3 + $0x2] ss:$0 sm:$0xff] }
 0x341   : > { %3325 = vrcp.f32 %v1381_v27 }
 0x342   : > { %3327 = vrcp.f32 %v1380_v43 }
 0x343   : > { %v3318_v18 = vpop.eup %3317  ;;  %3329 = vpow2.f32 %v2754_v40 }
 0x344   : > { %v3320_v49 = vpop.eup %3319  ;;  %v1383_v52 = vadd.f32 1.0, %v3318_v18  ;;  %3331 = vpow2.f32 %v2753_v47 }
 0x345   : > { %v1382_v37 = vadd.f32 1.0, %v3320_v49 }
 0x346   : > { %3333 = vrcp.f32 %v1383_v52 }
 0x347   : > { %v3322_v38 = vpop.eup %3321  ;;  %3335 = vrcp.f32 %v1382_v37 }
 0x348   : > { %v3324_v54 = vpop.eup %3323  ;;  %v1385_v24 = vadd.f32 1.0, %v3322_v38 }
 0x349   : > { %v1384_v55 = vadd.f32 1.0, %v3324_v54 }
 0x34a   : > { %3337 = vrcp.f32 %v1385_v24 }
 0x34b   : > { %v3326_v56 = vpop.eup %3325  ;;  %3339 = vrcp.f32 %v1384_v55 }
 0x34c   : > { %v3328_v58 = vpop.eup %3327  ;;  %v1405_v0 = vmul.f32 %v3326_v56, %v3950_v28 }
 0x34d   : > { %v3330_v59 = vpop.eup %3329  ;;  %v1404_v60 = vmul.f32 %v3328_v58, %v1348_v45 }
 0x34e   : > { %v3332_v61 = vpop.eup %3331  ;;  %v1387_v1 = vadd.f32 1.0, %v3330_v59 }
 0x34f   : > { %v1386_v2 = vadd.f32 1.0, %v3332_v61  ;;  %2994 = vmatprep.mubr.msk.f32.mxu0 %vm1420_vm2, %v1404_v60 }
 0x350   : > { %v3334_v4 = vpop.eup %3333  ;;  %3341 = vrcp.f32 %v1387_v1  ;;  %2995 = vmatmul.mubr.msk.f32.vlgmr.msra.gmra.mrb[8].mxu0 %vm1420_vm2, %v1405_v0 }
 0x351   : > { %v3336_v7 = vpop.eup %3335  ;;  %v1407_v10 = vmul.f32 %v3334_v4, %v1351_v30  ;;  %3343 = vrcp.f32 %v1386_v2  ;;  %v1606_v30 = vld [vmem:[%s4225_s2 + $0x60] sm:$0xff] }
 0x352   : > { %v1406_v11 = vmul.f32 %v3336_v7, %v1350_v31  ;;  %v1607_v31 = vld [vmem:[%s4225_s2 + $0x68] sm:$0xff] }
 0x354   : > { %v3338_v33 = vpop.eup %3337  ;;  %2997 = vmatprep.mubr.msk.f32.mxu0 %vm1420_vm2, %v1406_v11 }
 0x355   : > { %v3340_v15 = vpop.eup %3339  ;;  %v1409_v45 = vmul.f32 %v3338_v33, %v1353_v32  ;;  %2998 = vmatmul.mubr.msk.f32.gmra.mrb[10].mxu0 %vm1420_vm2, %v1407_v10  ;;  %v3127_v32 = vpack.c.bf16 %v1607_v31, %v1606_v30 }
 0x356   : > { %v1408_v28 = vmul.f32 %v3340_v15, %v1352_v14  ;;  %v1608_v14 = vld [vmem:[%s4225_s2 + $0x70] sm:$0xff] }
 0x357   : > { %3128 = vmatprep.subr.bf16.mxu1 %v3127_v32 }
 0x358   : > { %3000 = vmatprep.mubr.msk.f32.mxu0 %vm1420_vm2, %v1408_v28  ;;  %3130 = vmatpush3.bf16.msra.mxu1 %v3127_v32 }
 0x359   : > { %3001 = vmatmul.mubr.msk.f32.gmra.mrb[12].mxu0 %vm1420_vm2, %v1409_v45 }
 0x35a   : > { %v3342_v20 = vpop.eup %3341 }
 0x35b   : > { %v3344_v22 = vpop.eup %3343  ;;  %v1411_v23 = vmul.f32 %v3342_v20, %v1355_v25  ;;  %v1609_v25 = vld [vmem:[%s4225_s2 + $0x78] sm:$0xff] }
 0x35c   : > { %v1410_v34 = vmul.f32 %v3344_v22, %v1354_v26  ;;  %v3131_v26 = vpack.c.bf16 %v1609_v25, %v1608_v14 }
 0x35e   : > { %3003 = vmatprep.mubr.msk.f32.mxu0 %vm1420_vm2, %v1410_v34  ;;  %3132 = vmatprep.subr.bf16.mxu1 %v3131_v26 }
 0x35f   : > { %3004 = vmatmul.mubr.msk.f32.gmra.mrb[14].mxu0 %vm1420_vm2, %v1411_v23  ;;  %3134 = vmatpush3.bf16.msra.mxu1 %v3131_v26 }
 0x360   : > { %3034 = vmatprep.mubr.msk.f32.mxu0 %vm3540_vm5, %v3538_v48 }
 0x423   : > { %v2996_v27 = vpop.f32.mrb[8].mxu0 }
 0x424   : > { %v1517_v40 = vadd.f32 %v2996_v27, %v2755_v35  ;;  %v1511_v43 = vpop.f32.mrb[9].mxu0 }
 0x425   : > { %v1512_v47 = vadd.f32 %v2755_v35, %v1511_v43 }
 0x426   : > { %v2765_v18 = vmul.f32 -1.442695, %v1517_v40 }
 0x427   : > { %v2764_v49 = vmul.f32 -1.442695, %v1512_v47 }
 0x428   : > { %3345 = vpow2.f32 %v2765_v18  ;;  %v2999_v52 = vpop.f32.mrb[10].mxu0 }
 0x429   : > { %3347 = vpow2.f32 %v2764_v49  ;;  %v1527_v37 = vadd.f32 %v2999_v52, %v2755_v35  ;;  %v1521_v38 = vpop.f32.mrb[11].mxu0 }
 0x42a   : > { %v1522_v54 = vadd.f32 %v2755_v35, %v1521_v38 }
 0x42b   : > { %v2767_v24 = vmul.f32 -1.442695, %v1527_v37 }
 0x42c   : > { %v2766_v55 = vmul.f32 -1.442695, %v1522_v54  ;;  %v3002_v56 = vpop.f32.mrb[12].mxu0 }
 0x42d   : > { %3349 = vpow2.f32 %v2767_v24  ;;  %v1537_v58 = vadd.f32 %v3002_v56, %v2755_v35  ;;  %v1531_v59 = vpop.f32.mrb[13].mxu0 }
 0x42e   : > { %3351 = vpow2.f32 %v2766_v55  ;;  %v1532_v60 = vadd.f32 %v2755_v35, %v1531_v59 }
 0x42f   : > { %v2769_v61 = vmul.f32 -1.442695, %v1537_v58 }
 0x430   : > { %v2768_v0 = vmul.f32 -1.442695, %v1532_v60 }
 0x431   : > { %3353 = vpow2.f32 %v2769_v61 }
 0x432   : > { %v3346_v1 = vpop.eup %3345  ;;  %3355 = vpow2.f32 %v2768_v0  ;;  %v3005_v2 = vpop.f32.mrb[14].mxu0 }
 0x433   : > { %v3348_v4 = vpop.eup %3347  ;;  %v1575_v7 = vadd.f32 1.0, %v3346_v1  ;;  %v1547_v10 = vadd.f32 %v3005_v2, %v2755_v35  ;;  %v1541_v11 = vpop.f32.mrb[15].mxu0 }
 0x434   : > { %v1574_v33 = vadd.f32 1.0, %v3348_v4  ;;  %v1542_v15 = vadd.f32 %v2755_v35, %v1541_v11 }
 0x435   : > { %3357 = vrcp.f32 %v1575_v7  ;;  %v2771_v45 = vmul.f32 -1.442695, %v1547_v10 }
 0x436   : > { %3359 = vrcp.f32 %v1574_v33  ;;  %v2770_v28 = vmul.f32 -1.442695, %v1542_v15 }
 0x437   : > { %v3350_v20 = vpop.eup %3349  ;;  %3361 = vpow2.f32 %v2771_v45 }
 0x438   : > { %v3352_v22 = vpop.eup %3351  ;;  %v1577_v23 = vadd.f32 1.0, %v3350_v20  ;;  %3363 = vpow2.f32 %v2770_v28 }
 0x439   : > { %v1576_v34 = vadd.f32 1.0, %v3352_v22 }
 0x43a   : > { %3365 = vrcp.f32 %v1577_v23 }
 0x43b   : > { %v3354_v30 = vpop.eup %3353  ;;  %3367 = vrcp.f32 %v1576_v34 }
 0x43c   : > { %v3356_v31 = vpop.eup %3355  ;;  %v1579_v32 = vadd.f32 1.0, %v3354_v30 }
 0x43d   : > { %v1578_v14 = vadd.f32 1.0, %v3356_v31 }
 0x43e   : > { %3369 = vrcp.f32 %v1579_v32 }
 0x43f   : > { %v3358_v25 = vpop.eup %3357  ;;  %3371 = vrcp.f32 %v1578_v14 }
 0x440   : > { %v3360_v26 = vpop.eup %3359  ;;  %v3983_v35 = vmul.f32 %v3358_v25, %v1517_v40 }
 0x441   : > { %v3362_v27 = vpop.eup %3361  ;;  %v3985_v43 = vmul.f32 %v3360_v26, %v1512_v47 }
 0x442   : > { %v3364_v18 = vpop.eup %3363  ;;  %v1581_v49 = vadd.f32 1.0, %v3362_v27 }
 0x443   : > { %v3148_v52 = vpack.c.bf16 %v3983_v35, %v3985_v43  ;;  %v1580_v38 = vadd.f32 1.0, %v3364_v18  ;;  %3014 = vmatprep.mubr.msk.f32.mxu1 %vm1420_vm2, %v3985_v43 }
 0x444   : > { %v3366_v24 = vpop.eup %3365  ;;  %3373 = vrcp.f32 %v1581_v49  ;;  %3015 = vmatmul.mubr.msk.f32.vlgmr.msra.gmra.mrb[8].mxu1 %vm1420_vm2, %v3983_v35 }
 0x445   : > { %v3368_v55 = vpop.eup %3367  ;;  %v3993_v40 = vmul.f32 %v3366_v24, %v1527_v37  ;;  %3375 = vrcp.f32 %v1580_v38 }
 0x446   : > { %v3995_v47 = vmul.f32 %v3368_v55, %v1522_v54 }
 0x448   : > { %v3370_v56 = vpop.eup %3369  ;;  %v3151_v59 = vpack.c.bf16 %v3993_v40, %v3995_v47  ;;  %3017 = vmatprep.mubr.msk.f32.mxu1 %vm1420_vm2, %v3995_v47  ;;  %v2069_v47 = vld [vmem:[#allocation5 + $0x8] sm:$0xff] }
 0x449   : > { %v3372_v61 = vpop.eup %3371  ;;  %v4001_v0 = vmul.f32 %v3370_v56, %v1537_v58  ;;  %3018 = vmatmul.mubr.msk.f32.gmra.mrb[10].mxu1 %vm1420_vm2, %v3993_v40  ;;  %v2068_v40 = vld [vmem:[#allocation5] sm:$0xff] }
 0x44a   : > { %v4005_v1 = vmul.f32 %v3372_v61, %v1532_v60  ;;  %v2772_v60 = vld [vmem:[%s4226_s3 + $0x3] ss:$0 sm:$0xff] }
 0x44c   : > { %v3154_v37 = vpack.c.bf16 %v4001_v0, %v4005_v1  ;;  %3020 = vmatprep.mubr.msk.f32.mxu1 %vm1420_vm2, %v4005_v1 }
 0x44d   : > { %3021 = vmatmul.mubr.msk.f32.gmra.mrb[12].mxu1 %vm1420_vm2, %v4001_v0 }
 0x44e   : > { %v3374_v54 = vpop.eup %3373 }
 0x44f   : > { %v3376_v2 = vpop.eup %3375  ;;  %v4013_v4 = vmul.f32 %v3374_v54, %v1547_v10 }
 0x450   : > { %v4015_v58 = vmul.f32 %v3376_v2, %v1542_v15 }
 0x452   : > { %v3157_v7 = vpack.c.bf16 %v4013_v4, %v4015_v58  ;;  %3023 = vmatprep.mubr.msk.f32.mxu1 %vm1420_vm2, %v4015_v58 }
 0x453   : > { %3024 = vmatmul.mubr.msk.f32.gmra.mrb[14].mxu1 %vm1420_vm2, %v4013_v4 }
 0x454   : > { %3045 = vmatprep.mubr.msk.f32.mxu1 %vm3540_vm5, %v3538_v48 }
 0x517   : > { %v3016_v11 = vpop.f32.mrb[8].mxu1 }
 0x518   : > { %v1710_v33 = vadd.f32 %v3016_v11, %v2772_v60  ;;  %v1704_v45 = vpop.f32.mrb[9].mxu1 }
 0x519   : > { %v1705_v10 = vadd.f32 %v2772_v60, %v1704_v45 }
 0x51a   : > { %v2782_v28 = vmul.f32 -1.442695, %v1710_v33 }
 0x51b   : > { %v2781_v15 = vmul.f32 -1.442695, %v1705_v10 }
 0x51c   : > { %3377 = vpow2.f32 %v2782_v28  ;;  %v3019_v20 = vpop.f32.mrb[10].mxu1 }
 0x51d   : > { %3379 = vpow2.f32 %v2781_v15  ;;  %v1720_v22 = vadd.f32 %v3019_v20, %v2772_v60  ;;  %v1714_v23 = vpop.f32.mrb[11].mxu1 }
 0x51e   : > { %v1715_v34 = vadd.f32 %v2772_v60, %v1714_v23 }
 0x51f   : > { %v2784_v30 = vmul.f32 -1.442695, %v1720_v22 }
 0x520   : > { %v2783_v31 = vmul.f32 -1.442695, %v1715_v34  ;;  %v3022_v32 = vpop.f32.mrb[12].mxu1 }
 0x521   : > { %3381 = vpow2.f32 %v2784_v30  ;;  %v1730_v14 = vadd.f32 %v3022_v32, %v2772_v60  ;;  %v1724_v25 = vpop.f32.mrb[13].mxu1 }
 0x522   : > { %3383 = vpow2.f32 %v2783_v31  ;;  %v1725_v26 = vadd.f32 %v2772_v60, %v1724_v25 }
 0x523   : > { %v2786_v27 = vmul.f32 -1.442695, %v1730_v14 }
 0x524   : > { %v2785_v18 = vmul.f32 -1.442695, %v1725_v26 }
 0x525   : > { %3385 = vpow2.f32 %v2786_v27 }
 0x526   : > { %v3378_v49 = vpop.eup %3377  ;;  %3387 = vpow2.f32 %v2785_v18  ;;  %v3025_v38 = vpop.f32.mrb[14].mxu1 }
 0x527   : > { %v3380_v24 = vpop.eup %3379  ;;  %v1768_v55 = vadd.f32 1.0, %v3378_v49  ;;  %v1740_v56 = vadd.f32 %v3025_v38, %v2772_v60  ;;  %v1734_v61 = vpop.f32.mrb[15].mxu1 }
 0x528   : > { %v1767_v54 = vadd.f32 1.0, %v3380_v24  ;;  %v1735_v2 = vadd.f32 %v2772_v60, %v1734_v61  ;;  %v2789_v60 = vld [vmem:[%s4226_s3 + $0x4] ss:$0 sm:$0xff] }
 0x529   : > { %3389 = vrcp.f32 %v1768_v55  ;;  %v2788_v11 = vmul.f32 -1.442695, %v1740_v56 }
 0x52a   : > { %3391 = vrcp.f32 %v1767_v54  ;;  %v2787_v45 = vmul.f32 -1.442695, %v1735_v2 }
 0x52b   : > { %v3382_v28 = vpop.eup %3381  ;;  %3393 = vpow2.f32 %v2788_v11 }
 0x52c   : > { %v3384_v15 = vpop.eup %3383  ;;  %v1770_v20 = vadd.f32 1.0, %v3382_v28  ;;  %3395 = vpow2.f32 %v2787_v45 }
 0x52d   : > { %v1769_v23 = vadd.f32 1.0, %v3384_v15 }
 0x52e   : > { %3397 = vrcp.f32 %v1770_v20 }
 0x52f   : > { %v3386_v30 = vpop.eup %3385  ;;  %3399 = vrcp.f32 %v1769_v23 }
 0x530   : > { %v3388_v31 = vpop.eup %3387  ;;  %v1772_v32 = vadd.f32 1.0, %v3386_v30 }
 0x531   : > { %v1771_v25 = vadd.f32 1.0, %v3388_v31 }
 0x532   : > { %3401 = vrcp.f32 %v1772_v32 }
 0x533   : > { %v3390_v27 = vpop.eup %3389  ;;  %3403 = vrcp.f32 %v1771_v25 }
 0x534   : > { %v3392_v18 = vpop.eup %3391  ;;  %v1792_v49 = vmul.f32 %v3390_v27, %v1710_v33 }
 0x535   : > { %v3394_v38 = vpop.eup %3393  ;;  %v1791_v24 = vmul.f32 %v3392_v18, %v1705_v10 }
 0x536   : > { %v3396_v55 = vpop.eup %3395  ;;  %v1774_v61 = vadd.f32 1.0, %v3394_v38  ;;  %v1804_v54 = vmul.f32 %v2789_v60, %v1792_v49 }
 0x537   : > { %v1773_v11 = vadd.f32 1.0, %v3396_v55  ;;  %v1803_v45 = vmul.f32 %v2789_v60, %v1791_v24 }
 0x538   : > { %v3398_v28 = vpop.eup %3397  ;;  %3405 = vrcp.f32 %v1774_v61  ;;  %v1814_v15 = vsel %vm1420_vm2, %v1804_v54, 0.0 }
 0x539   : > { %v3400_v20 = vpop.eup %3399  ;;  %v1794_v23 = vmul.f32 %v3398_v28, %v1720_v22  ;;  %3407 = vrcp.f32 %v1773_v11  ;;  %1815 = vadd.xlane.f32.xlu1 %v1814_v15  ;;  %v1811_v30 = vsel %vm1420_vm2, %v1803_v45, 0.0 }
 0x53a   : > { %v1793_v31 = vmul.f32 %v3400_v20, %v1715_v34  ;;  %1812 = vadd.xlane.f32.xlu0 %v1811_v30  ;;  %v3539_v20 = vmov 0.0|0.0  }
 0x53b   : > { %v1806_v33 = vmul.f32 %v2789_v60, %v1794_v23  ;;  %3135 = vmatprep.subr.bf16.mxu0 %v3539_v20  ;;  %3141 = vmatprep.subr.bf16.mxu1 %v3539_v20 }
 0x53c   : > { %v3402_v32 = vpop.eup %3401  ;;  %v1805_v10 = vmul.f32 %v2789_v60, %v1793_v31 }
 0x53d   : > { %v3404_v25 = vpop.eup %3403  ;;  %v1796_v27 = vmul.f32 %v3402_v32, %v1730_v14  ;;  %v1820_v18 = vsel %vm1420_vm2, %v1806_v33, 0.0 }
 0x53e   : > { %v1795_v49 = vmul.f32 %v3404_v25, %v1725_v26  ;;  %1821 = vadd.xlane.f32.xlu1 %v1820_v18  ;;  %v1817_v38 = vsel %vm1420_vm2, %v1805_v10, 0.0 }
 0x53f   : > { %1818 = vadd.xlane.f32.xlu0 %v1817_v38  ;;  %v1808_v24 = vmul.f32 %v2789_v60, %v1796_v27  ;;  %v2262_v38 = vld [vmem:[%s4225_s2 + $0xa0] sm:$0xff] (!%p2794_p5) }
 0x540   : > { %v1807_v22 = vmul.f32 %v2789_v60, %v1795_v49 }
 0x541   : > { %v1826_v55 = vsel %vm1420_vm2, %v1808_v24, 0.0  ;;  %v2263_v24 = vld [vmem:[%s4225_s2 + $0xa8] sm:$0xff] (!%p2794_p5) }
 0x542   : > { %v3406_v61 = vpop.eup %3405  ;;  %1827 = vadd.xlane.f32.xlu1 %v1826_v55  ;;  %v1823_v34 = vsel %vm1420_vm2, %v1807_v22, 0.0  ;;  %v2264_v22 = vld [vmem:[%s4225_s2 + $0xb0] sm:$0xff] (!%p2794_p5)  ;;  %v3159_v55 = vpack.c.bf16 (!%p2794_p5), %v2263_v24, %v2262_v38 }
 0x543   : > { %v3408_v54 = vpop.eup %3407  ;;  %v1798_v11 = vmul.f32 %v3406_v61, %v1740_v56  ;;  %1824 = vadd.xlane.f32.xlu0 %v1823_v34  ;;  %v2265_v61 = vld [vmem:[%s4225_s2 + $0xb8] sm:$0xff] (!%p2794_p5) }
 0x544   : > { %v1797_v45 = vmul.f32 %v3408_v54, %v1735_v2  ;;  %v3541_v54 = vmov (!%p2794_p5), 3  }
 0x545   : > { %v1810_v14 = vmul.f32 %v2789_v60, %v1798_v11  ;;  %v3163_v11 = vpack.c.bf16 (!%p2794_p5), %v2265_v61, %v2264_v22 }
 0x546   : > { %v1809_v28 = vmul.f32 %v2789_v60, %v1797_v45  ;;  %v2258_v45 = vld [vmem:[%s4225_s2 + $0x80] sm:$0xff] (!%p2794_p5) }
 0x547   : > { %v1832_v26 = vsel %vm1420_vm2, %v1810_v14, 0.0  ;;  %v2259_v14 = vld [vmem:[%s4225_s2 + $0x88] sm:$0xff] (!%p2794_p5) }
 0x548   : > { %1833 = vadd.xlane.f32.xlu1 %v1832_v26  ;;  %v1829_v15 = vsel %vm1420_vm2, %v1809_v28, 0.0 }
 0x549   : > { %1830 = vadd.xlane.f32.xlu0 %v1829_v15 }
 0x576   : > { %3300 = vxpose.xlu0.b32.start [1/4] (short) (narrow) %v3299_v17, 8 }
 0x57a   : > { %3302 = vxpose.xlu0.b32.cont [2/4] (short) (narrow) %v3301_v6, 8 }
 0x57e   : > { %3304 = vxpose.xlu0.b32.cont [3/4] (short) (narrow) %v3303_v21, 8 }
 0x582   : > { %3306 = vxpose.xlu0.b32.end [4/4] (short) (narrow) %v3305_v13, 8 }
 0x5ab   : > { %3312 = vset.pattern.permute.xlu0 %v3535_v29 }
 0x5ac   : > { %3409 = vset.pattern.permute.xlu0 (!%p2794_p5), %v3541_v54 }
 0x5c6   : > { %v1816_v57 = vpop.xlane.xlu1 %1815 }
 0x5c7   : > { %v1836_v16 = vmul.f32 %v3892_v39, %v1816_v57  ;;  %v1813_v17 = vpop.xlane.xlu0 %1812  ;;  %v2260_v57 = vld [vmem:[%s4225_s2 + $0x90] sm:$0xff] (!%p2794_p5) }
 0x5c8   : > { %v1835_v56 = vmul.f32 %v1813_v17, %v3896_v41 }
 0x5c9   : > { %v1844_v2 = vsel %vm1299_vm4, %v1836_v16, 1.0  ;;  %v2261_v16 = vld [vmem:[%s4225_s2 + $0x98] sm:$0xff] (!%p2794_p5) }
 0x5ca   : > { %v1843_v62 = vsel %vm1299_vm4, %v1835_v56, 1.0 }
 0x5cb   : > { %v3136_v5 = vpack.c.bf16 %v1844_v2, %v1843_v62  ;;  %v1822_v6 = vpop.xlane.xlu1 %1821  ;;  %v3171_v2 = vpack.c.bf16 (!%p2794_p5), %v2261_v16, %v2260_v57  ;;  %v2446_v62 = vld [vmem:[%s4227_s4] sm:$0xff] (!%p2794_p5) }
 0x5cc   : > { %v1838_v63 = vmul.f32 %v3905_v46, %v1822_v6  ;;  %v1819_v19 = vpop.xlane.xlu0 %1818 }
 0x5cd   : > { %v1837_v3 = vmul.f32 %v1819_v19, %v3910_v50  ;;  %3137 = vmatpush3.bf16.msra.mxu0 %v3136_v5  ;;  %v2447_v5 = vld [vmem:[%s4227_s4 + $0x8] sm:$0xff] (!%p2794_p5)  ;;  %v2449_v19 = vld [vmem:[%s4227_s4 + $0x18] sm:$0xff] (!%p2794_p5) }
 0x5ce   : > { %v1846_v29 = vsel %vm1299_vm4, %v1838_v63, 1.0  ;;  %3138 = vmatprep.subr.bf16.mxu0 %v3539_v20  ;;  %v3175_v6 = vpack.c.bf16 (!%p2794_p5), %v2447_v5, %v2446_v62  ;;  %v2448_v63 = vld [vmem:[%s4227_s4 + $0x10] sm:$0xff] (!%p2794_p5) }
 0x5cf   : > { %v1845_v12 = vsel %vm1299_vm4, %v1837_v3, 1.0  ;;  %v1828_v13 = vpop.xlane.xlu1 %1827  ;;  %v3179_v3 = vpack.c.bf16 (!%p2794_p5), %v2449_v19, %v2448_v63 }
 0x5d0   : > { %v3139_v21 = vpack.c.bf16 %v1846_v29, %v1845_v12  ;;  %v1840_v39 = vmul.f32 %v3898_v42, %v1828_v13  ;;  %v1825_v41 = vpop.xlane.xlu0 %1824 }
 0x5d1   : > { %v1839_v60 = vmul.f32 %v1825_v41, %v3902_v44 }
 0x5d2   : > { %v1848_v23 = vsel %vm1299_vm4, %v1840_v39, 1.0  ;;  %3140 = vmatpush3.bf16.msra.mxu0 %v3139_v21 }
 0x5d3   : > { %v1847_v46 = vsel %vm1299_vm4, %v1839_v60, 1.0  ;;  %3147 = vmatprep.subr.bf16.mxu0 %v3539_v20 }
 0x5d4   : > { %v3142_v50 = vpack.c.bf16 %v1848_v23, %v1847_v46 }
 0x5d5   : > { %v1834_v30 = vpop.xlane.xlu1 %1833 }
 0x5d6   : > { %v1842_v31 = vmul.f32 %v3912_v51, %v1834_v30  ;;  %v1831_v33 = vpop.xlane.xlu0 %1830  ;;  %3143 = vmatpush3.bf16.msra.mxu1 %v3142_v50  ;;  %v1851_v51 = vld [vmem:[#allocation4] sm:$0xff] }
 0x5d7   : > { %v1841_v32 = vmul.f32 %v1831_v33, %v3916_v53  ;;  %3144 = vmatprep.subr.bf16.mxu1 %v3539_v20  ;;  %v1852_v53 = vld [vmem:[#allocation4 + $0x8] sm:$0xff] }
 0x5d8   : > { %v1850_v42 = vsel %vm1299_vm4, %v1842_v31, 1.0 }
 0x5d9   : > { %v1849_v10 = vsel %vm1299_vm4, %v1841_v32, 1.0 }
 0x5da   : > { %v3145_v44 = vpack.c.bf16 %v1850_v42, %v1849_v10 }
 0x5dc   : > { %3146 = vmatpush3.bf16.msra.mxu1 %v3145_v44 }
 0x5dd   : > { %3153 = vmatprep.subr.bf16.mxu1 %v3539_v20 }
 0x5f6   : > { %v3307_v25 = vpop.trf.xlu0 }
 0x5f7   : > { %v3311_v27 = vunpack.i.h.bf16 %v3307_v25  ;;  %v3308_v18 = vunpack.i.l.bf16 %v3307_v25 }
 0x5f9   : > { %3035 = vmatmul.mubr.msk.f32.vlgmr.msra.gmra.mrb[16].mxu0 %vm1420_vm2, %v3308_v18  ;;  %3046 = vmatmul.mubr.msk.f32.vlgmr.msra.gmra.mrb[16].mxu1 %vm1420_vm2, %v3311_v27 }
 0x5fa   : > { %3149 = vmatpush3.bf16.msra.mxu0 %v3148_v52  ;;  %3155 = vmatpush3.bf16.msra.mxu1 %v3154_v37 }
 0x5fb   : > { %3150 = vmatprep.subr.bf16.mxu0 %v3539_v20  ;;  %3156 = vmatprep.subr.bf16.mxu1 %v3539_v20  ;;  %v3167_v20 = vpack.c.bf16 (!%p2794_p5), %v2259_v14, %v2258_v45 }
 0x5fc   : > { %3056 = vmatprep.mubr.msk.f32.mxu0 %vm3540_vm5, %v3538_v48  ;;  %3067 = vmatprep.mubr.msk.f32.mxu1 %vm3540_vm5, %v3538_v48 }
 0x5fe   : > { %3152 = vmatpush3.bf16.msra.mxu0 %v3151_v59  ;;  %3158 = vmatpush3.bf16.msra.mxu1 %v3157_v7 }
 0x5ff   : > { %3160 = vmatprep.subr.bf16.mxu0 (!%p2794_p5), %v3159_v55  ;;  %3176 = vmatprep.subr.bf16.mxu1 (!%p2794_p5), %v3175_v6 }
 0x601   : > { %3057 = vmatmul.mubr.msk.f32.vlgmr.msra.gmra.mrb[18].mxu0 %vm1420_vm2, %v3308_v18  ;;  %3068 = vmatmul.mubr.msk.f32.vlgmr.msra.gmra.mrb[18].mxu1 %vm1420_vm2, %v3311_v27 }
 0x602   : > { %3162 = vmatpush3.bf16.msra.mxu0 (!%p2794_p5), %v3159_v55  ;;  %3178 = vmatpush3.bf16.msra.mxu1 (!%p2794_p5), %v3175_v6 }
 0x603   : > { %3164 = vmatprep.subr.bf16.mxu0 (!%p2794_p5), %v3163_v11  ;;  %3180 = vmatprep.subr.bf16.mxu1 (!%p2794_p5), %v3179_v3 }
 0x606   : > { %3166 = vmatpush3.bf16.msra.mxu0 (!%p2794_p5), %v3163_v11  ;;  %3182 = vmatpush3.bf16.msra.mxu1 (!%p2794_p5), %v3179_v3 }
 0x607   : > { %3168 = vmatprep.subr.bf16.mxu0 (!%p2794_p5), %v3167_v20 }
 0x6cc   : > { %v1954_v35 = vpop.f32.mrb[16].mxu0  ;;  %v2059_v43 = vpop.f32.mrb[16].mxu1 }
 0x6cd   : > { %v2063_v52 = vadd.f32 %v1954_v35, %v1851_v51  ;;  %v2064_v0 = vadd.f32 %v2059_v43, %v1852_v53  ;;  %v3036_v48 = vpop.f32.mrb[17].mxu0  ;;  %v3047_v1 = vpop.f32.mrb[17].mxu1 }
 0x6cf   : > { %2066 = vst.msk [vmem:[#allocation4] sm:$0xff] %vm2065_vm6, %v2063_v52  ;;  %2067 = vst.msk [vmem:[#allocation4 + $0x8] sm:$0xff] %vm2065_vm6, %v2064_v0  ;;  %v2802_v0 = vld [vmem:[%s4228_s5] ss:$0 sm:$0xff] (!%p2794_p5) }
 0x6d1   : > { %2217 = sbr.rel (%p2794_p5) target bundleno = 2230 (0x8b6), region = 90 }
 0x6d4   : > { %v2136_v59 = vpop.f32.mrb[18].mxu0  ;;  %v2206_v37 = vpop.f32.mrb[18].mxu1 }
 0x6d5   : > { %v2210_v4 = vadd.f32 %v2136_v59, %v2068_v40  ;;  %v2211_v58 = vadd.f32 %v2206_v37, %v2069_v47  ;;  %v3058_v7 = vpop.f32.mrb[19].mxu0  ;;  %v3069_v49 = vpop.f32.mrb[19].mxu1 }
 0x6d6   : > { %v2218_v28 = vld [vmem:[#allocation4] sm:$0xff] (!%p2794_p5)  ;;  %v2219_v26 = vld [vmem:[#allocation4 + $0x8] sm:$0xff] (!%p2794_p5) }
 0x6d7   : > { %2212 = vst.msk [vmem:[#allocation5] sm:$0xff] %vm1420_vm2, %v2210_v4  ;;  %2213 = vst.msk [vmem:[#allocation5 + $0x8] sm:$0xff] %vm1420_vm2, %v2211_v58  ;;  %v2220_v15 = vmax.f32 (!%p2794_p5), %v2218_v28, 1.0  ;;  %v2221_v17 = vmax.f32 (!%p2794_p5), %v2219_v26, 1.0 }
 0x6d9   : > { %2224 = vperm.xlu0 %3409, %v2220_v15  }
 0x6dd   : > { %2229 = vperm.xlu0 %3409, %v2221_v17  }
 0x6de   : > { %v2256_v34 = vld [vmem:[#allocation5] sm:$0xff]  ;;  %v2257_v56 = vld [vmem:[#allocation5 + $0x8] sm:$0xff] }
 0x6df   : > { %3078 = vmatprep.mubr.msk.f32.mxu0 %vm1420_vm2, %v2256_v34 }
 0x6e0   : > { %3079 = vmatmul.mubr.msk.f32.vlgmr.msra.gmra.mrb[0].mxu0 %vm1420_vm2, %v2257_v56 }
 0x6e1   : > { %3170 = vmatpush3.bf16.msra.mxu0 %v3167_v20  ;;  %3089 = vmatprep.mubr.msk.f32.mxu0 %vm1420_vm2, %v3701_v8 }
 0x6e2   : > { %3172 = vmatprep.subr.bf16.mxu0 %v3171_v2 }
 0x6e5   : > { %3174 = vmatpush3.bf16.msra.mxu0 %v3171_v2 }
 0x6e8   : > { %3090 = vmatmul.mubr.msk.f32.vlgmr.msra.gmra.mrb[0].mxu0 %vm1420_vm2, %v3703_v9 }
 0x758   : > { %v2225_v29 = vpop.permute.xlu0 %2224 }
 0x759   : > { %3410 = vrcp.f32 %v2225_v29 }
 0x75c   : > { %v2230_v12 = vpop.permute.xlu0 %2229 }
 0x75d   : > { %3412 = vrcp.f32 %v2230_v12 }
 0x763   : > { %v3411_v13 = vpop.eup %3410 }
 0x764   : > { %v2233_v21 = vmul.f32 %v3411_v13, %v2218_v28 }
 0x766   : > { %2238 = vrot.lane.b32.xlu1 %v2233_v21, %s3542_s16 }
 0x767   : > { %v3413_v39 = vpop.eup %3412 }
 0x768   : > { %v2235_v41 = vmul.f32 %v3413_v39, %v2219_v26 }
 0x76a   : > { %2240 = vrot.lane.b32.xlu1 %v2235_v41, %s3542_s16 }
 0x7bb   : > { %v3091_v60 = vpop.f32.mrb[0].mxu0 }
 0x7bc   : > { %v2431_v23 = vadd.f32 %v3091_v60, %v3759_v36  ;;  %v2417_v46 = vpop.f32.mrb[1].mxu0 }
 0x7bd   : > { %v2430_v50 = vadd.f32 %v3759_v36, %v2417_v46 }
 0x7be   : > { %v2801_v30 = vmul.f32 -1.442695, %v2431_v23 }
 0x7bf   : > { %v2800_v31 = vmul.f32 -1.442695, %v2430_v50 }
 0x7c0   : > { %3414 = vpow2.f32 %v2801_v30 }
 0x7c1   : > { %3416 = vpow2.f32 %v2800_v31 }
 0x7ca   : > { %v3415_v33 = vpop.eup %3414 }
 0x7cb   : > { %v3417_v32 = vpop.eup %3416  ;;  %v2439_v42 = vadd.f32 1.0, %v3415_v33 }
 0x7cc   : > { %v2438_v10 = vadd.f32 1.0, %v3417_v32 }
 0x7cd   : > { %3418 = vrcp.f32 %v2439_v42 }
 0x7ce   : > { %3420 = vrcp.f32 %v2438_v10 }
 0x7d7   : > { %v3419_v44 = vpop.eup %3418 }
 0x7d8   : > { %v3421_v25 = vpop.eup %3420  ;;  %v2445_v18 = vmul.f32 %v3419_v44, %v2431_v23  ;;  %v2239_v51 = vpop.permute.xlu1 %2238 }
 0x7d9   : > { %v2444_v27 = vmul.f32 %v3421_v25, %v2430_v50  ;;  %v2244_v36 = vadd.f32 %v2239_v51, %v3701_v8 }
 0x7db   : > { %3100 = vmatprep.mubr.msk.f32.mxu1 %vm1420_vm2, %v2444_v27  ;;  %2248 = vrot.lane.b32.xlu0 %v2244_v36, %s3543_s20 }
 0x7dc   : > { %3101 = vmatmul.mubr.msk.f32.vlgmr.msra.gmra.mrb[0].mxu1 %vm1420_vm2, %v2445_v18  ;;  %v2241_v53 = vpop.permute.xlu1 %2240 }
 0x7dd   : > { %v2245_v35 = vadd.f32 %v2241_v53, %v3703_v9 }
 0x7df   : > { %2250 = vrot.lane.b32.xlu1 %v2245_v35, %s3543_s20 }
 0x84d   : > { %v2249_v43 = vpop.permute.xlu0 %2248 }
 0x84e   : > { %2254 = vst.msk [vmem:[%s3699_s0] sm:$0xff] %vm1299_vm4, %v2249_v43 }
 0x851   : > { %v2251_v52 = vpop.permute.xlu1 %2250 }
 0x852   : > { %2255 = vst.msk [vmem:[%s3699_s0 + $0x8] sm:$0xff] %vm1299_vm4, %v2251_v52 }
 0x8af   : > { %v3102_v48 = vpop.f32.mrb[0].mxu1 }
 0x8b0   : > { %v2535_v1 = vadd.f32 %v3102_v48, %v2802_v0  ;;  %v2529_v40 = vpop.f32.mrb[1].mxu1 }
 0x8b1   : > { %v2530_v47 = vadd.f32 %v2802_v0, %v2529_v40 }
 0x8b2   : > { %v2539_v59 = vadd.f32 %v2535_v1, %v3703_v9 }
 0x8b3   : > { %v2538_v37 = vadd.f32 %v2530_v47, %v3701_v8 }
 0x8b4   : > { %2541 = vst.msk [vmem:[%s3707_s13 + $0x8] sm:$0xff] %vm1420_vm2, %v2539_v59 }
 0x8b5   : > { %2540 = vst.msk [vmem:[%s3707_s13] sm:$0xff] %vm1420_vm2, %v2538_v37 }
 0x8b6 PF: > { %s2811_s0 = sshll.u32 %s3520_s30, 8  ;;  %s2561_s27 = sshll.u32 %s3707_s13, 4  ;;  %s4161_s27 = int_to_ptr.vmem [resolvable:$true] %s2561_s27 }
 0x8b7   : > { %s4158_s21 = scalar_lea.hbm %s4229_s6, %s2811_s0  ;;  %s4244_s29 = sand.u32 1, %s3500_s25  }
 0x8b8   : > { %s4165_s15 = scalar_lea.sflag [#allocation8], %s4244_s29  ;;  %s3422_s14 = scalar_lea.vmem %s4161_s27, 256 }
 0x8b9   : > { %p3423_p6 = scmp.ne.s32.totalorder %s4161_s27, %s3422_s14  ;;  %s3544_s30 = smov [#allocation7]  }
 0x8ba   : > { %s3426_s12 = sshll.u32 %s3544_s30, 4  ;;  %s3427_s12 = int_to_ptr.vmem [resolvable:$false] %s3426_s12 }
 0x8bb   : > { %p3424_p8 = pnand %p3423_p6, %p3659_p7  ;;  %s3428_s16 = scalar_lea.vmem %s3427_s12, 512 }
 0x8bc   : > { %p3429_p10 = scmp.lt.s32.totalorder %s4161_s27, %s3427_s12  ;;  %p3430_p11 = scmp.lt.s32.totalorder %s3428_s16, %s3422_s14 }
 0x8bd   : > { %p3425_p9 = pneg %p3424_p8 }
 0x8be   : > { %p3431_p13 = por %p3430_p11, %p3429_p10 }
 0x8c0   : > { %p3432_p0 = pnand %p3431_p13, %p3425_p9 }
 0x8c2   : > { %3435 = shalt.err (!%p3432_p0)
}
 0x8c3   : > { %s3436_s13 = scalar_lea.hbm %s4158_s21, 256  ;;  %s3440_s18 = scalar_lea.hbm %s4229_s6, 512 }
 0x8c4   : > { %p3437_p1 = scmp.ne.s32.totalorder %s4158_s21, %s3436_s13  ;;  %p3441_p4 = scmp.lt.u32.totalorder %s4158_s21, %s4229_s6 }
 0x8c5   : > { %p3442_p5 = scmp.lt.u32.totalorder %s3440_s18, %s3436_s13  ;;  %p3444_p8 = scmp.lt.u32.totalorder %s3436_s13, %s4158_s21 }
 0x8c6   : > { %p3438_p2 = pnand %p3437_p1, %p3659_p7 }
 0x8c7   : > { %p3443_p6 = por %p3442_p5, %p3441_p4 }
 0x8c8   : > { %p3439_p3 = pneg %p3438_p2 }
 0x8c9   : > { %p3445_p9 = por %p3444_p8, %p3443_p6 }
 0x8cb   : > { %p3446_p10 = pnand %p3445_p9, %p3439_p3 }
 0x8cd   : > { %3449 = shalt.err (!%p3446_p10)
}
 0x8ce   : > { %s3545_s22 = smov 128   ;;  %s3546_s29 = smov 8  }
 0x8cf   : > { %3193 = dma.vmem_to_hbm [thread:$0]  (%p3659_p7), %s4161_s27, 256, %s4158_s21, %s4165_s15, %s3545_s22, %s3545_s22, %s3546_s29  }
 0x8d0 PF: > { %p3199_p11 = scmp.ge.s32.totalorder %s3532_s10, 2  ;;  %s2580_s30 = sand.u32 1, %s3496_s24  }
 0x8d1   : > { %s2581_s12 = scalar_lea.sflag [#allocation8], %s2580_s30 }
 0x8d2   : > { %p3196_p13 = pnand %p3199_p11, %p3667_p12 }
 0x8d4   : > { %3491 = dma.done.wait (!%p3196_p13), %s2581_s12, 256  }
 0x8d5   : > { %3493 = vsyncadd (!%p3196_p13), %s2581_s12, 4294967040  ;;  %s21_s10 = sadd.s32 1, %s3532_s10   ;;  %s4246_s19 = sld [smem:[#allocation13_spill]] }
 0x8d6   : > { %p18_p0 = scmp.ge.s32.totalorder %s21_s10, 6   ;;  %s4247_s21 = sld [smem:[#allocation10_spill]] }
 0x8d7   : > { %s4248_s15 = sld [smem:[#allocation11_spill]]  ;;  %s4249_s24 = smov %s3500_s25 }
 0x8d8   : > { %s4250_s25 = smov %s3504_s26  ;;  %s4251_s26 = smov %s3672_s23 }
 0x8d9   : > { %s4252_s27 = smov %s3512_s28  ;;  %s4254_s29 = smov %s3524_s8 }
 0x8da   : > { %s4255_s30 = smov %s3528_s9  ;;  %20 = sbr.rel (!%p18_p0) target bundleno = 8 (0x8), region = 145 }
 0x8db   : > { %s4253_s28 = smov %s4246_s19 }
 0x8dc   : > { %s4256_s8 = smov %s4247_s21 }
 0x8dd   : > { %s4257_s9 = smov %s4248_s15 }
 0x8e1   :  { %2594 = vsyncpa [#allocation8], 1 }
 0x8e2   :  { %2596 = vsyncpa [#allocation8 + $0x1], 1 }

</bundles_post_ra>
